<compile_context>
chip_gen: v5e
topology: v5e:2x2
jax: 0.10.0
libtpu: 0.0.40
codegen_flags: <defaults>
</compile_context>

<pallas_src>
import functools

import jax
import jax.numpy as jnp
import numpy as np
from jax.experimental import pallas as pl
from jax.experimental.pallas import tpu as pltpu

_LANES = 128  # one vreg lane block


def _round_up(x, m):
    return ((x + m - 1) // m) * m


def _lstm_estimator_kernel(uy1_ref, w_in_ref, w_hh_ref, w_out_ref, out_ref, gx_ref,
                           *, seq_len, batch_pad, hidden, flipped):
    T, Bp, H = seq_len, batch_pad, hidden
    L = _LANES

    # ---- Preamble (off the serial recurrence): input + bias projection for ALL
    # timesteps in one (T*Bp, n_in+1) @ (n_in+1, 2L) matmul into VMEM scratch.
    gx_ref[...] = jnp.dot(uy1_ref[...], w_in_ref[...],
                          preferred_element_type=jnp.float32)

    # Lane masks hoisted out of the loop (broadcast_in_dim is not CSE'd by JAX).
    lane = jax.lax.broadcasted_iota(jnp.int32, (Bp, L), 1)
    m_lo = lane < H                            # primary gate lanes   [0, H)
    m_hi = (lane >= 64) & (lane < 64 + H)      # secondary gate lanes [64, 64+H)
    m_last = lane == (L - 1)                   # "ones" lane for folded output bias

    h0 = jnp.zeros((Bp, L), jnp.float32)
    c0 = jnp.zeros((Bp, L), jnp.float32)

    def step(t, carry):
        h, c = carry
        idx = (T - 1 - t) if flipped else t          # flipped == reverse-time read
        row = pl.multiple_of(idx * Bp, Bp)           # Bp % 8 == 0 -> aligned load
        gx = gx_ref[pl.ds(row, Bp), :]               # (Bp, 2L), tile-aligned

        # Recurrent projection: w_hh is read from VMEM inside the loop (streamed
        # into the MXU per step) rather than held live across the unroll.
        gates = gx + jnp.dot(h, w_hh_ref[...], preferred_element_type=jnp.float32)
        gA = gates[:, :L]          # [ i @ [0,H) | o @ [64,64+H) ]  (both sigmoid)
        gB = gates[:, L:]          # [ f @ [0,H) | g @ [64,64+H) ]  (sigmoid / tanh)

        # sigmoid(x) = 0.5*(1 + tanh(x/2)): one EUP push per 128-lane block.
        sA = 0.5 * (1.0 + jnp.tanh(0.5 * gA))
        tB = jnp.tanh(jnp.where(m_lo, 0.5 * gB, gB))

        i_g = jnp.where(m_lo, sA, 0.0)                               # i at [0,H)
        o_g = pltpu.roll(sA, shift=64, axis=1)                       # o -> [0,H)
        f_g = jnp.where(m_lo, 0.5 * (1.0 + tB), 0.0)                 # f at [0,H)
        g_g = pltpu.roll(jnp.where(m_hi, tB, 0.0), shift=64, axis=1)  # g -> [0,H)

        c_new = f_g * c + i_g * g_g            # lanes >= H stay exactly 0
        h_new = o_g * jnp.tanh(c_new)          # lanes >= H stay exactly 0
        return (h_new, c_new)

    hN, _ = jax.lax.fori_loop(0, T, step, (h0, c0), unroll=min(T, 8))

    # Output projection; bias folded into row L-1 of w_out via a "ones" lane
    # (hN is guaranteed zero there). Output is lane-dense (Bp, 128).
    hN_aug = jnp.where(m_last, 1.0, hN)
    out_ref[...] = jnp.dot(hN_aug, w_out_ref[...], preferred_element_type=jnp.float32)


def prepare_params(params, *, n_u, n_y, hidden_size, n_x):
    """One-time parameter preprocessing: transpose, bias folding, gate packing.

    Packed layout (2 lane blocks of 128):
      block A: i @ cols [0,H),       o @ cols [64, 64+H)
      block B: f @ cols [128,128+H), g @ cols [192, 192+H)
    All other columns / rows are zero, so padded lanes of h / c stay zero.
    """
    H = hidden_size
    L = _LANES
    assert H <= 64, "packed-gate layout requires hidden_size <= 64"
    assert n_x <= L, "output width must fit one lane block"

    w_ih = jnp.asarray(params["w_ih"], jnp.float32)      # (4H, n_u+n_y), rows [i|f|g|o]
    w_hh = jnp.asarray(params["w_hh"], jnp.float32)      # (4H, H)
    b = (jnp.asarray(params["b_ih"], jnp.float32)
         + jnp.asarray(params["b_hh"], jnp.float32))     # (4H,)
    w_out = jnp.asarray(params["w_out"], jnp.float32)    # (n_x, H)
    b_out = jnp.asarray(params["b_out"], jnp.float32)    # (n_x,)

    # torch gate row-group -> packed column offset
    gate_cols = {0: 0, 3: 64, 1: L, 2: L + 64}           # i, o, f, g

    def pack_cols(w_t):                                   # (rows, 4H) -> (rows, 2L)
        out = jnp.zeros((w_t.shape[0], 2 * L), jnp.float32)
        for g_idx, col0 in gate_cols.items():
            out = out.at[:, col0:col0 + H].set(w_t[:, g_idx * H:(g_idx + 1) * H])
        return out

    # Input projection with the LSTM biases folded in as a trailing "ones" row.
    w_in = jnp.concatenate([pack_cols(w_ih.T), pack_cols(b.reshape(1, 4 * H))], axis=0)
    # Recurrent weights (L, 2L); rows >= H zero so padded h lanes contribute nothing.
    w_hh_p = jnp.zeros((L, 2 * L), jnp.float32).at[:H].set(pack_cols(w_hh.T))
    # Output projection, lane-dense (L, L); output bias folded into row L-1.
    w_out_p = (jnp.zeros((L, L), jnp.float32)
               .at[:H, :n_x].set(w_out.T)
               .at[L - 1, :n_x].set(b_out))

    return {"w_in": w_in, "w_hh": w_hh_p, "w_out": w_out_p, "H": H, "n_x": n_x}


def lstm_state_estimator(u, y, prepared, *, flipped=False):
    """Pallas implementation of LSTMStateEstimator.forward (batch_first=False)."""
    T, B, n_u = u.shape
    n_y = y.shape[-1]
    H = prepared["H"]
    n_x = prepared["n_x"]
    Bp = _round_up(max(B, 1), 8)              # sublane-aligned batch
    n_in1 = n_u + n_y + 1

    # Single fused input array [u | y | 1] (ones column carries the LSTM bias),
    # batch-padded to Bp so per-step kernel loads are tile-aligned.
    uy1 = jnp.concatenate(
        [u.astype(jnp.float32), y.astype(jnp.float32),
         jnp.ones((T, B, 1), jnp.float32)], axis=-1)
    if Bp != B:
        uy1 = jnp.pad(uy1, ((0, 0), (0, Bp - B), (0, 0)))
    uy1 = uy1.reshape(T * Bp, n_in1)

    kernel = functools.partial(_lstm_estimator_kernel, seq_len=T, batch_pad=Bp,
                               hidden=H, flipped=bool(flipped))

    out = pl.pallas_call(
        kernel,
        out_shape=jax.ShapeDtypeStruct((Bp, _LANES), jnp.float32),
        in_specs=[pl.BlockSpec(memory_space=pltpu.MemorySpace.VMEM)] * 4,
        out_specs=pl.BlockSpec(memory_space=pltpu.MemorySpace.VMEM),
        scratch_shapes=[pltpu.VMEM((T * Bp, 2 * _LANES), jnp.float32)],  # gates_x slab
    )(uy1, prepared["w_in"], prepared["w_hh"], prepared["w_out"])

    return out[:B, :n_x]


def lstm_state_estimator_ref(u, y, params, *, hidden_size, n_x, flipped=False):
    """Pure-JAX reference mirroring PyTorch nn.LSTM + nn.Linear."""
    uy = jnp.concatenate((u, y), axis=-1)
    if flipped:
        uy = jnp.flip(uy, axis=0)
    T, B, _ = uy.shape
    H = hidden_size
    w_ih, w_hh = params["w_ih"], params["w_hh"]
    b = params["b_ih"] + params["b_hh"]

    def step(carry, x_t):
        h, c = carry
        gates = x_t @ w_ih.T + h @ w_hh.T + b
        i = jax.nn.sigmoid(gates[:, 0 * H:1 * H])
        f = jax.nn.sigmoid(gates[:, 1 * H:2 * H])
        g = jnp.tanh(gates[:, 2 * H:3 * H])
        o = jax.nn.sigmoid(gates[:, 3 * H:4 * H])
        c_new = f * c + i * g
        h_new = o * jnp.tanh(c_new)
        return (h_new, c_new), None

    h0 = jnp.zeros((B, H), jnp.float32)
    c0 = jnp.zeros((B, H), jnp.float32)
    (hN, _), _ = jax.lax.scan(step, (h0, c0), uy)
    return hN @ params["w_out"].T + params["b_out"]


def init_params(key, n_u, n_y, n_x, hidden_size):
    """Deterministic init matching PyTorch parameter shapes (uniform +/- 1/sqrt(H))."""
    D_in = n_u + n_y
    H = hidden_size
    k = 1.0 / np.sqrt(H)
    keys = jax.random.split(key, 6)
    return {
        "w_ih": jax.random.uniform(keys[0], (4 * H, D_in), jnp.float32, -k, k),
        "w_hh": jax.random.uniform(keys[1], (4 * H, H), jnp.float32, -k, k),
        "b_ih": jax.random.uniform(keys[2], (4 * H,), jnp.float32, -k, k),
        "b_hh": jax.random.uniform(keys[3], (4 * H,), jnp.float32, -k, k),
        "w_out": jax.random.uniform(keys[4], (n_x, H), jnp.float32, -k, k),
        "b_out": jax.random.uniform(keys[5], (n_x,), jnp.float32, -k, k),
    }


if __name__ == "__main__":
    # seq=8, batch=2, n_u=2, n_y=1, n_x=3, hidden=16 (module default),
    # batch_first=False.
    T, B, n_u, n_y, n_x, hidden = 8, 2, 2, 1, 3, 16

    key = jax.random.PRNGKey(0)
    k_u, k_y, k_p = jax.random.split(key, 3)
    u = jax.random.normal(k_u, (T, B, n_u), jnp.float32)
    y = jax.random.normal(k_y, (T, B, n_y), jnp.float32)
    params = init_params(k_p, n_u, n_y, n_x, hidden)

    # One-time parameter preprocessing (hoisted out of the per-call path).
    prepared = prepare_params(params, n_u=n_u, n_y=n_y,
                              hidden_size=hidden, n_x=n_x)

    # flipped=False (module default)
    xN = jax.block_until_ready(lstm_state_estimator(u, y, prepared, flipped=False))
    assert xN.shape == (B, n_x)
    xN_ref = lstm_state_estimator_ref(u, y, params, hidden_size=hidden,
                                      n_x=n_x, flipped=False)
    np.testing.assert_allclose(np.asarray(xN), np.asarray(xN_ref),
                               rtol=2e-5, atol=2e-5)

    # flipped=True path (reverse-time indexing inside the kernel)
    xN_f = jax.block_until_ready(
        lstm_state_estimator(u, y, prepared, flipped=True))
    xN_f_ref = lstm_state_estimator_ref(u, y, params, hidden_size=hidden,
                                        n_x=n_x, flipped=True)
    np.testing.assert_allclose(np.asarray(xN_f), np.asarray(xN_f_ref),
                               rtol=2e-5, atol=2e-5)

    print("KERNEL_OK")
</pallas_src>

<mosaic_0001>
module attributes {stable_mosaic.version = 11 : i64} {
  func.func @_lstm_estimator_kernel(%arg0: memref<64x4xf32, #tpu.memory_space<vmem>>, %arg1: memref<4x256xf32, #tpu.memory_space<vmem>>, %arg2: memref<128x256xf32, #tpu.memory_space<vmem>>, %arg3: memref<128x128xf32, #tpu.memory_space<vmem>>, %arg4: memref<8x128xf32, #tpu.memory_space<vmem>>, %arg5: memref<64x256xf32, #tpu.memory_space<vmem>>) attributes {dimension_semantics = [], scalar_prefetch = 0 : i64, scratch_operands = 1 : i64, tpu.core_type = #tpu.core_type<tc>} {
    %c0 = arith.constant 0 : index
    %c0_0 = arith.constant 0 : index
    %0 = vector.load %arg0[%c0, %c0_0] : memref<64x4xf32, #tpu.memory_space<vmem>>, vector<64x4xf32>
    %c0_1 = arith.constant 0 : index
    %c0_2 = arith.constant 0 : index
    %1 = vector.load %arg1[%c0_1, %c0_2] : memref<4x256xf32, #tpu.memory_space<vmem>>, vector<4x256xf32>
    %cst = arith.constant dense<0.000000e+00> : vector<64x256xf32>
    %2 = tpu.matmul %0, %1, %cst {dimension_numbers = #tpu.dot_dimension_numbers<[1], [0], [0], [1], [0, 0, 1, 1], [], []>} : vector<64x4xf32>, vector<4x256xf32>, vector<64x256xf32> -> vector<64x256xf32>
    %c0_3 = arith.constant 0 : index
    %c0_4 = arith.constant 0 : index
    %3 = vector.load %arg5[%c0_3, %c0_4] : memref<64x256xf32, #tpu.memory_space<vmem>>, vector<64x256xf32>
    tpu.vector_store %arg5[%c0_3, %c0_4], %2 {strides = array<i32>} : memref<64x256xf32, #tpu.memory_space<vmem>>, vector<64x256xf32>,
    %4 = tpu.iota {dimensions = array<i32: 1>} : vector<8x128xi32>
    %c16_i32 = arith.constant 16 : i32
    %5 = vector.broadcast %c16_i32 : i32 to vector<8x128xi32>
    %6 = arith.cmpi slt, %4, %5 : vector<8x128xi32>
    %c64_i32 = arith.constant 64 : i32
    %7 = vector.broadcast %c64_i32 : i32 to vector<8x128xi32>
    %8 = arith.cmpi sge, %4, %7 : vector<8x128xi32>
    %c80_i32 = arith.constant 80 : i32
    %9 = vector.broadcast %c80_i32 : i32 to vector<8x128xi32>
    %10 = arith.cmpi slt, %4, %9 : vector<8x128xi32>
    %11 = arith.andi %8, %10 : vector<8x128xi1>
    %c127_i32 = arith.constant 127 : i32
    %12 = vector.broadcast %c127_i32 : i32 to vector<8x128xi32>
    %13 = arith.cmpi eq, %4, %12 : vector<8x128xi32>
    %cst_5 = arith.constant 0.000000e+00 : f32
    %14 = vector.broadcast %cst_5 : f32 to vector<8x128xf32>
    %cst_6 = arith.constant 0.000000e+00 : f32
    %15 = vector.broadcast %cst_6 : f32 to vector<8x128xf32>
    %c0_i32 = arith.constant 0 : i32
    %c8_i32 = arith.constant 8 : i32
    %16 = arith.muli %c0_i32, %c8_i32 : i32
    %17 = tpu.assume_multiple %16, 8 : i32
    %18 = arith.index_cast %17 : i32 to index
    %c0_7 = arith.constant 0 : index
    %19 = vector.load %arg5[%18, %c0_7] : memref<64x256xf32, #tpu.memory_space<vmem>>, vector<8x256xf32>
    %c0_8 = arith.constant 0 : index
    %c0_9 = arith.constant 0 : index
    %20 = vector.load %arg2[%c0_8, %c0_9] : memref<128x256xf32, #tpu.memory_space<vmem>>, vector<128x256xf32>
    %cst_10 = arith.constant dense<0.000000e+00> : vector<8x256xf32>
    %21 = tpu.matmul %14, %20, %cst_10 {dimension_numbers = #tpu.dot_dimension_numbers<[1], [0], [0], [1], [0, 0, 1, 1], [], []>} : vector<8x128xf32>, vector<128x256xf32>, vector<8x256xf32> -> vector<8x256xf32>
    %22 = arith.addf %19, %21 : vector<8x256xf32>
    %23 = vector.extract_strided_slice %22 {offsets = [0, 0], sizes = [8, 128], strides = [1, 1]} : vector<8x256xf32> to vector<8x128xf32>
    %24 = vector.extract_strided_slice %22 {offsets = [0, 128], sizes = [8, 128], strides = [1, 1]} : vector<8x256xf32> to vector<8x128xf32>
    %cst_11 = arith.constant 5.000000e-01 : f32
    %25 = vector.broadcast %cst_11 : f32 to vector<8x128xf32>
    %26 = arith.mulf %25, %23 : vector<8x128xf32>
    %27 = math.tanh %26 : vector<8x128xf32>
    %cst_12 = arith.constant 1.000000e+00 : f32
    %28 = vector.broadcast %cst_12 : f32 to vector<8x128xf32>
    %29 = arith.addf %28, %27 : vector<8x128xf32>
    %cst_13 = arith.constant 5.000000e-01 : f32
    %30 = vector.broadcast %cst_13 : f32 to vector<8x128xf32>
    %31 = arith.mulf %30, %29 : vector<8x128xf32>
    %cst_14 = arith.constant 5.000000e-01 : f32
    %32 = vector.broadcast %cst_14 : f32 to vector<8x128xf32>
    %33 = arith.mulf %32, %24 : vector<8x128xf32>
    %34 = arith.select %6, %33, %24 : vector<8x128xi1>, vector<8x128xf32>
    %35 = math.tanh %34 : vector<8x128xf32>
    %cst_15 = arith.constant 0.000000e+00 : f32
    %36 = vector.broadcast %cst_15 : f32 to vector<8x128xf32>
    %37 = arith.select %6, %31, %36 : vector<8x128xi1>, vector<8x128xf32>
    %c64_i32_16 = arith.constant 64 : i32
    %38 = tpu.dynamic_rotate %31 by %c64_i32_16 dim 1 : vector<8x128xf32>, i32 -> vector<8x128xf32>
    %cst_17 = arith.constant 1.000000e+00 : f32
    %39 = vector.broadcast %cst_17 : f32 to vector<8x128xf32>
    %40 = arith.addf %39, %35 : vector<8x128xf32>
    %cst_18 = arith.constant 5.000000e-01 : f32
    %41 = vector.broadcast %cst_18 : f32 to vector<8x128xf32>
    %42 = arith.mulf %41, %40 : vector<8x128xf32>
    %cst_19 = arith.constant 0.000000e+00 : f32
    %43 = vector.broadcast %cst_19 : f32 to vector<8x128xf32>
    %44 = arith.select %6, %42, %43 : vector<8x128xi1>, vector<8x128xf32>
    %cst_20 = arith.constant 0.000000e+00 : f32
    %45 = vector.broadcast %cst_20 : f32 to vector<8x128xf32>
    %46 = arith.select %11, %35, %45 : vector<8x128xi1>, vector<8x128xf32>
    %c64_i32_21 = arith.constant 64 : i32
    %47 = tpu.dynamic_rotate %46 by %c64_i32_21 dim 1 : vector<8x128xf32>, i32 -> vector<8x128xf32>
    %48 = arith.mulf %44, %15 : vector<8x128xf32>
    %49 = arith.mulf %37, %47 : vector<8x128xf32>
    %50 = arith.addf %48, %49 : vector<8x128xf32>
    %51 = math.tanh %50 : vector<8x128xf32>
    %52 = arith.mulf %38, %51 : vector<8x128xf32>
    %c1_i32 = arith.constant 1 : i32
    %c8_i32_22 = arith.constant 8 : i32
    %53 = arith.muli %c1_i32, %c8_i32_22 : i32
    %54 = tpu.assume_multiple %53, 8 : i32
    %55 = arith.index_cast %54 : i32 to index
    %c0_23 = arith.constant 0 : index
    %56 = vector.load %arg5[%55, %c0_23] : memref<64x256xf32, #tpu.memory_space<vmem>>, vector<8x256xf32>
    %c0_24 = arith.constant 0 : index
    %c0_25 = arith.constant 0 : index
    %57 = vector.load %arg2[%c0_24, %c0_25] : memref<128x256xf32, #tpu.memory_space<vmem>>, vector<128x256xf32>
    %cst_26 = arith.constant dense<0.000000e+00> : vector<8x256xf32>
    %58 = tpu.matmul %52, %57, %cst_26 {dimension_numbers = #tpu.dot_dimension_numbers<[1], [0], [0], [1], [0, 0, 1, 1], [], []>} : vector<8x128xf32>, vector<128x256xf32>, vector<8x256xf32> -> vector<8x256xf32>
    %59 = arith.addf %56, %58 : vector<8x256xf32>
    %60 = vector.extract_strided_slice %59 {offsets = [0, 0], sizes = [8, 128], strides = [1, 1]} : vector<8x256xf32> to vector<8x128xf32>
    %61 = vector.extract_strided_slice %59 {offsets = [0, 128], sizes = [8, 128], strides = [1, 1]} : vector<8x256xf32> to vector<8x128xf32>
    %cst_27 = arith.constant 5.000000e-01 : f32
    %62 = vector.broadcast %cst_27 : f32 to vector<8x128xf32>
    %63 = arith.mulf %62, %60 : vector<8x128xf32>
    %64 = math.tanh %63 : vector<8x128xf32>
    %cst_28 = arith.constant 1.000000e+00 : f32
    %65 = vector.broadcast %cst_28 : f32 to vector<8x128xf32>
    %66 = arith.addf %65, %64 : vector<8x128xf32>
    %cst_29 = arith.constant 5.000000e-01 : f32
    %67 = vector.broadcast %cst_29 : f32 to vector<8x128xf32>
    %68 = arith.mulf %67, %66 : vector<8x128xf32>
    %cst_30 = arith.constant 5.000000e-01 : f32
    %69 = vector.broadcast %cst_30 : f32 to vector<8x128xf32>
    %70 = arith.mulf %69, %61 : vector<8x128xf32>
    %71 = arith.select %6, %70, %61 : vector<8x128xi1>, vector<8x128xf32>
    %72 = math.tanh %71 : vector<8x128xf32>
    %cst_31 = arith.constant 0.000000e+00 : f32
    %73 = vector.broadcast %cst_31 : f32 to vector<8x128xf32>
    %74 = arith.select %6, %68, %73 : vector<8x128xi1>, vector<8x128xf32>
    %c64_i32_32 = arith.constant 64 : i32
    %75 = tpu.dynamic_rotate %68 by %c64_i32_32 dim 1 : vector<8x128xf32>, i32 -> vector<8x128xf32>
    %cst_33 = arith.constant 1.000000e+00 : f32
    %76 = vector.broadcast %cst_33 : f32 to vector<8x128xf32>
    %77 = arith.addf %76, %72 : vector<8x128xf32>
    %cst_34 = arith.constant 5.000000e-01 : f32
    %78 = vector.broadcast %cst_34 : f32 to vector<8x128xf32>
    %79 = arith.mulf %78, %77 : vector<8x128xf32>
    %cst_35 = arith.constant 0.000000e+00 : f32
    %80 = vector.broadcast %cst_35 : f32 to vector<8x128xf32>
    %81 = arith.select %6, %79, %80 : vector<8x128xi1>, vector<8x128xf32>
    %cst_36 = arith.constant 0.000000e+00 : f32
    %82 = vector.broadcast %cst_36 : f32 to vector<8x128xf32>
    %83 = arith.select %11, %72, %82 : vector<8x128xi1>, vector<8x128xf32>
    %c64_i32_37 = arith.constant 64 : i32
    %84 = tpu.dynamic_rotate %83 by %c64_i32_37 dim 1 : vector<8x128xf32>, i32 -> vector<8x128xf32>
    %85 = arith.mulf %81, %50 : vector<8x128xf32>
    %86 = arith.mulf %74, %84 : vector<8x128xf32>
    %87 = arith.addf %85, %86 : vector<8x128xf32>
    %88 = math.tanh %87 : vector<8x128xf32>
    %89 = arith.mulf %75, %88 : vector<8x128xf32>
    %c2_i32 = arith.constant 2 : i32
    %c8_i32_38 = arith.constant 8 : i32
    %90 = arith.muli %c2_i32, %c8_i32_38 : i32
    %91 = tpu.assume_multiple %90, 8 : i32
    %92 = arith.index_cast %91 : i32 to index
    %c0_39 = arith.constant 0 : index
    %93 = vector.load %arg5[%92, %c0_39] : memref<64x256xf32, #tpu.memory_space<vmem>>, vector<8x256xf32>
    %c0_40 = arith.constant 0 : index
    %c0_41 = arith.constant 0 : index
    %94 = vector.load %arg2[%c0_40, %c0_41] : memref<128x256xf32, #tpu.memory_space<vmem>>, vector<128x256xf32>
    %cst_42 = arith.constant dense<0.000000e+00> : vector<8x256xf32>
    %95 = tpu.matmul %89, %94, %cst_42 {dimension_numbers = #tpu.dot_dimension_numbers<[1], [0], [0], [1], [0, 0, 1, 1], [], []>} : vector<8x128xf32>, vector<128x256xf32>, vector<8x256xf32> -> vector<8x256xf32>
    %96 = arith.addf %93, %95 : vector<8x256xf32>
    %97 = vector.extract_strided_slice %96 {offsets = [0, 0], sizes = [8, 128], strides = [1, 1]} : vector<8x256xf32> to vector<8x128xf32>
    %98 = vector.extract_strided_slice %96 {offsets = [0, 128], sizes = [8, 128], strides = [1, 1]} : vector<8x256xf32> to vector<8x128xf32>
    %cst_43 = arith.constant 5.000000e-01 : f32
    %99 = vector.broadcast %cst_43 : f32 to vector<8x128xf32>
    %100 = arith.mulf %99, %97 : vector<8x128xf32>
    %101 = math.tanh %100 : vector<8x128xf32>
    %cst_44 = arith.constant 1.000000e+00 : f32
    %102 = vector.broadcast %cst_44 : f32 to vector<8x128xf32>
    %103 = arith.addf %102, %101 : vector<8x128xf32>
    %cst_45 = arith.constant 5.000000e-01 : f32
    %104 = vector.broadcast %cst_45 : f32 to vector<8x128xf32>
    %105 = arith.mulf %104, %103 : vector<8x128xf32>
    %cst_46 = arith.constant 5.000000e-01 : f32
    %106 = vector.broadcast %cst_46 : f32 to vector<8x128xf32>
    %107 = arith.mulf %106, %98 : vector<8x128xf32>
    %108 = arith.select %6, %107, %98 : vector<8x128xi1>, vector<8x128xf32>
    %109 = math.tanh %108 : vector<8x128xf32>
    %cst_47 = arith.constant 0.000000e+00 : f32
    %110 = vector.broadcast %cst_47 : f32 to vector<8x128xf32>
    %111 = arith.select %6, %105, %110 : vector<8x128xi1>, vector<8x128xf32>
    %c64_i32_48 = arith.constant 64 : i32
    %112 = tpu.dynamic_rotate %105 by %c64_i32_48 dim 1 : vector<8x128xf32>, i32 -> vector<8x128xf32>
    %cst_49 = arith.constant 1.000000e+00 : f32
    %113 = vector.broadcast %cst_49 : f32 to vector<8x128xf32>
    %114 = arith.addf %113, %109 : vector<8x128xf32>
    %cst_50 = arith.constant 5.000000e-01 : f32
    %115 = vector.broadcast %cst_50 : f32 to vector<8x128xf32>
    %116 = arith.mulf %115, %114 : vector<8x128xf32>
    %cst_51 = arith.constant 0.000000e+00 : f32
    %117 = vector.broadcast %cst_51 : f32 to vector<8x128xf32>
    %118 = arith.select %6, %116, %117 : vector<8x128xi1>, vector<8x128xf32>
    %cst_52 = arith.constant 0.000000e+00 : f32
    %119 = vector.broadcast %cst_52 : f32 to vector<8x128xf32>
    %120 = arith.select %11, %109, %119 : vector<8x128xi1>, vector<8x128xf32>
    %c64_i32_53 = arith.constant 64 : i32
    %121 = tpu.dynamic_rotate %120 by %c64_i32_53 dim 1 : vector<8x128xf32>, i32 -> vector<8x128xf32>
    %122 = arith.mulf %118, %87 : vector<8x128xf32>
    %123 = arith.mulf %111, %121 : vector<8x128xf32>
    %124 = arith.addf %122, %123 : vector<8x128xf32>
    %125 = math.tanh %124 : vector<8x128xf32>
    %126 = arith.mulf %112, %125 : vector<8x128xf32>
    %c3_i32 = arith.constant 3 : i32
    %c8_i32_54 = arith.constant 8 : i32
    %127 = arith.muli %c3_i32, %c8_i32_54 : i32
    %128 = tpu.assume_multiple %127, 8 : i32
    %129 = arith.index_cast %128 : i32 to index
    %c0_55 = arith.constant 0 : index
    %130 = vector.load %arg5[%129, %c0_55] : memref<64x256xf32, #tpu.memory_space<vmem>>, vector<8x256xf32>
    %c0_56 = arith.constant 0 : index
    %c0_57 = arith.constant 0 : index
    %131 = vector.load %arg2[%c0_56, %c0_57] : memref<128x256xf32, #tpu.memory_space<vmem>>, vector<128x256xf32>
    %cst_58 = arith.constant dense<0.000000e+00> : vector<8x256xf32>
    %132 = tpu.matmul %126, %131, %cst_58 {dimension_numbers = #tpu.dot_dimension_numbers<[1], [0], [0], [1], [0, 0, 1, 1], [], []>} : vector<8x128xf32>, vector<128x256xf32>, vector<8x256xf32> -> vector<8x256xf32>
    %133 = arith.addf %130, %132 : vector<8x256xf32>
    %134 = vector.extract_strided_slice %133 {offsets = [0, 0], sizes = [8, 128], strides = [1, 1]} : vector<8x256xf32> to vector<8x128xf32>
    %135 = vector.extract_strided_slice %133 {offsets = [0, 128], sizes = [8, 128], strides = [1, 1]} : vector<8x256xf32> to vector<8x128xf32>
    %cst_59 = arith.constant 5.000000e-01 : f32
    %136 = vector.broadcast %cst_59 : f32 to vector<8x128xf32>
    %137 = arith.mulf %136, %134 : vector<8x128xf32>
    %138 = math.tanh %137 : vector<8x128xf32>
    %cst_60 = arith.constant 1.000000e+00 : f32
    %139 = vector.broadcast %cst_60 : f32 to vector<8x128xf32>
    %140 = arith.addf %139, %138 : vector<8x128xf32>
    %cst_61 = arith.constant 5.000000e-01 : f32
    %141 = vector.broadcast %cst_61 : f32 to vector<8x128xf32>
    %142 = arith.mulf %141, %140 : vector<8x128xf32>
    %cst_62 = arith.constant 5.000000e-01 : f32
    %143 = vector.broadcast %cst_62 : f32 to vector<8x128xf32>
    %144 = arith.mulf %143, %135 : vector<8x128xf32>
    %145 = arith.select %6, %144, %135 : vector<8x128xi1>, vector<8x128xf32>
    %146 = math.tanh %145 : vector<8x128xf32>
    %cst_63 = arith.constant 0.000000e+00 : f32
    %147 = vector.broadcast %cst_63 : f32 to vector<8x128xf32>
    %148 = arith.select %6, %142, %147 : vector<8x128xi1>, vector<8x128xf32>
    %c64_i32_64 = arith.constant 64 : i32
    %149 = tpu.dynamic_rotate %142 by %c64_i32_64 dim 1 : vector<8x128xf32>, i32 -> vector<8x128xf32>
    %cst_65 = arith.constant 1.000000e+00 : f32
    %150 = vector.broadcast %cst_65 : f32 to vector<8x128xf32>
    %151 = arith.addf %150, %146 : vector<8x128xf32>
    %cst_66 = arith.constant 5.000000e-01 : f32
    %152 = vector.broadcast %cst_66 : f32 to vector<8x128xf32>
    %153 = arith.mulf %152, %151 : vector<8x128xf32>
    %cst_67 = arith.constant 0.000000e+00 : f32
    %154 = vector.broadcast %cst_67 : f32 to vector<8x128xf32>
    %155 = arith.select %6, %153, %154 : vector<8x128xi1>, vector<8x128xf32>
    %cst_68 = arith.constant 0.000000e+00 : f32
    %156 = vector.broadcast %cst_68 : f32 to vector<8x128xf32>
    %157 = arith.select %11, %146, %156 : vector<8x128xi1>, vector<8x128xf32>
    %c64_i32_69 = arith.constant 64 : i32
    %158 = tpu.dynamic_rotate %157 by %c64_i32_69 dim 1 : vector<8x128xf32>, i32 -> vector<8x128xf32>
    %159 = arith.mulf %155, %124 : vector<8x128xf32>
    %160 = arith.mulf %148, %158 : vector<8x128xf32>
    %161 = arith.addf %159, %160 : vector<8x128xf32>
    %162 = math.tanh %161 : vector<8x128xf32>
    %163 = arith.mulf %149, %162 : vector<8x128xf32>
    %c4_i32 = arith.constant 4 : i32
    %c8_i32_70 = arith.constant 8 : i32
    %164 = arith.muli %c4_i32, %c8_i32_70 : i32
    %165 = tpu.assume_multiple %164, 8 : i32
    %166 = arith.index_cast %165 : i32 to index
    %c0_71 = arith.constant 0 : index
    %167 = vector.load %arg5[%166, %c0_71] : memref<64x256xf32, #tpu.memory_space<vmem>>, vector<8x256xf32>
    %c0_72 = arith.constant 0 : index
    %c0_73 = arith.constant 0 : index
    %168 = vector.load %arg2[%c0_72, %c0_73] : memref<128x256xf32, #tpu.memory_space<vmem>>, vector<128x256xf32>
    %cst_74 = arith.constant dense<0.000000e+00> : vector<8x256xf32>
    %169 = tpu.matmul %163, %168, %cst_74 {dimension_numbers = #tpu.dot_dimension_numbers<[1], [0], [0], [1], [0, 0, 1, 1], [], []>} : vector<8x128xf32>, vector<128x256xf32>, vector<8x256xf32> -> vector<8x256xf32>
    %170 = arith.addf %167, %169 : vector<8x256xf32>
    %171 = vector.extract_strided_slice %170 {offsets = [0, 0], sizes = [8, 128], strides = [1, 1]} : vector<8x256xf32> to vector<8x128xf32>
    %172 = vector.extract_strided_slice %170 {offsets = [0, 128], sizes = [8, 128], strides = [1, 1]} : vector<8x256xf32> to vector<8x128xf32>
    %cst_75 = arith.constant 5.000000e-01 : f32
    %173 = vector.broadcast %cst_75 : f32 to vector<8x128xf32>
    %174 = arith.mulf %173, %171 : vector<8x128xf32>
    %175 = math.tanh %174 : vector<8x128xf32>
    %cst_76 = arith.constant 1.000000e+00 : f32
    %176 = vector.broadcast %cst_76 : f32 to vector<8x128xf32>
    %177 = arith.addf %176, %175 : vector<8x128xf32>
    %cst_77 = arith.constant 5.000000e-01 : f32
    %178 = vector.broadcast %cst_77 : f32 to vector<8x128xf32>
    %179 = arith.mulf %178, %177 : vector<8x128xf32>
    %cst_78 = arith.constant 5.000000e-01 : f32
    %180 = vector.broadcast %cst_78 : f32 to vector<8x128xf32>
    %181 = arith.mulf %180, %172 : vector<8x128xf32>
    %182 = arith.select %6, %181, %172 : vector<8x128xi1>, vector<8x128xf32>
    %183 = math.tanh %182 : vector<8x128xf32>
    %cst_79 = arith.constant 0.000000e+00 : f32
    %184 = vector.broadcast %cst_79 : f32 to vector<8x128xf32>
    %185 = arith.select %6, %179, %184 : vector<8x128xi1>, vector<8x128xf32>
    %c64_i32_80 = arith.constant 64 : i32
    %186 = tpu.dynamic_rotate %179 by %c64_i32_80 dim 1 : vector<8x128xf32>, i32 -> vector<8x128xf32>
    %cst_81 = arith.constant 1.000000e+00 : f32
    %187 = vector.broadcast %cst_81 : f32 to vector<8x128xf32>
    %188 = arith.addf %187, %183 : vector<8x128xf32>
    %cst_82 = arith.constant 5.000000e-01 : f32
    %189 = vector.broadcast %cst_82 : f32 to vector<8x128xf32>
    %190 = arith.mulf %189, %188 : vector<8x128xf32>
    %cst_83 = arith.constant 0.000000e+00 : f32
    %191 = vector.broadcast %cst_83 : f32 to vector<8x128xf32>
    %192 = arith.select %6, %190, %191 : vector<8x128xi1>, vector<8x128xf32>
    %cst_84 = arith.constant 0.000000e+00 : f32
    %193 = vector.broadcast %cst_84 : f32 to vector<8x128xf32>
    %194 = arith.select %11, %183, %193 : vector<8x128xi1>, vector<8x128xf32>
    %c64_i32_85 = arith.constant 64 : i32
    %195 = tpu.dynamic_rotate %194 by %c64_i32_85 dim 1 : vector<8x128xf32>, i32 -> vector<8x128xf32>
    %196 = arith.mulf %192, %161 : vector<8x128xf32>
    %197 = arith.mulf %185, %195 : vector<8x128xf32>
    %198 = arith.addf %196, %197 : vector<8x128xf32>
    %199 = math.tanh %198 : vector<8x128xf32>
    %200 = arith.mulf %186, %199 : vector<8x128xf32>
    %c5_i32 = arith.constant 5 : i32
    %c8_i32_86 = arith.constant 8 : i32
    %201 = arith.muli %c5_i32, %c8_i32_86 : i32
    %202 = tpu.assume_multiple %201, 8 : i32
    %203 = arith.index_cast %202 : i32 to index
    %c0_87 = arith.constant 0 : index
    %204 = vector.load %arg5[%203, %c0_87] : memref<64x256xf32, #tpu.memory_space<vmem>>, vector<8x256xf32>
    %c0_88 = arith.constant 0 : index
    %c0_89 = arith.constant 0 : index
    %205 = vector.load %arg2[%c0_88, %c0_89] : memref<128x256xf32, #tpu.memory_space<vmem>>, vector<128x256xf32>
    %cst_90 = arith.constant dense<0.000000e+00> : vector<8x256xf32>
    %206 = tpu.matmul %200, %205, %cst_90 {dimension_numbers = #tpu.dot_dimension_numbers<[1], [0], [0], [1], [0, 0, 1, 1], [], []>} : vector<8x128xf32>, vector<128x256xf32>, vector<8x256xf32> -> vector<8x256xf32>
    %207 = arith.addf %204, %206 : vector<8x256xf32>
    %208 = vector.extract_strided_slice %207 {offsets = [0, 0], sizes = [8, 128], strides = [1, 1]} : vector<8x256xf32> to vector<8x128xf32>
    %209 = vector.extract_strided_slice %207 {offsets = [0, 128], sizes = [8, 128], strides = [1, 1]} : vector<8x256xf32> to vector<8x128xf32>
    %cst_91 = arith.constant 5.000000e-01 : f32
    %210 = vector.broadcast %cst_91 : f32 to vector<8x128xf32>
    %211 = arith.mulf %210, %208 : vector<8x128xf32>
    %212 = math.tanh %211 : vector<8x128xf32>
    %cst_92 = arith.constant 1.000000e+00 : f32
    %213 = vector.broadcast %cst_92 : f32 to vector<8x128xf32>
    %214 = arith.addf %213, %212 : vector<8x128xf32>
    %cst_93 = arith.constant 5.000000e-01 : f32
    %215 = vector.broadcast %cst_93 : f32 to vector<8x128xf32>
    %216 = arith.mulf %215, %214 : vector<8x128xf32>
    %cst_94 = arith.constant 5.000000e-01 : f32
    %217 = vector.broadcast %cst_94 : f32 to vector<8x128xf32>
    %218 = arith.mulf %217, %209 : vector<8x128xf32>
    %219 = arith.select %6, %218, %209 : vector<8x128xi1>, vector<8x128xf32>
    %220 = math.tanh %219 : vector<8x128xf32>
    %cst_95 = arith.constant 0.000000e+00 : f32
    %221 = vector.broadcast %cst_95 : f32 to vector<8x128xf32>
    %222 = arith.select %6, %216, %221 : vector<8x128xi1>, vector<8x128xf32>
    %c64_i32_96 = arith.constant 64 : i32
    %223 = tpu.dynamic_rotate %216 by %c64_i32_96 dim 1 : vector<8x128xf32>, i32 -> vector<8x128xf32>
    %cst_97 = arith.constant 1.000000e+00 : f32
    %224 = vector.broadcast %cst_97 : f32 to vector<8x128xf32>
    %225 = arith.addf %224, %220 : vector<8x128xf32>
    %cst_98 = arith.constant 5.000000e-01 : f32
    %226 = vector.broadcast %cst_98 : f32 to vector<8x128xf32>
    %227 = arith.mulf %226, %225 : vector<8x128xf32>
    %cst_99 = arith.constant 0.000000e+00 : f32
    %228 = vector.broadcast %cst_99 : f32 to vector<8x128xf32>
    %229 = arith.select %6, %227, %228 : vector<8x128xi1>, vector<8x128xf32>
    %cst_100 = arith.constant 0.000000e+00 : f32
    %230 = vector.broadcast %cst_100 : f32 to vector<8x128xf32>
    %231 = arith.select %11, %220, %230 : vector<8x128xi1>, vector<8x128xf32>
    %c64_i32_101 = arith.constant 64 : i32
    %232 = tpu.dynamic_rotate %231 by %c64_i32_101 dim 1 : vector<8x128xf32>, i32 -> vector<8x128xf32>
    %233 = arith.mulf %229, %198 : vector<8x128xf32>
    %234 = arith.mulf %222, %232 : vector<8x128xf32>
    %235 = arith.addf %233, %234 : vector<8x128xf32>
    %236 = math.tanh %235 : vector<8x128xf32>
    %237 = arith.mulf %223, %236 : vector<8x128xf32>
    %c6_i32 = arith.constant 6 : i32
    %c8_i32_102 = arith.constant 8 : i32
    %238 = arith.muli %c6_i32, %c8_i32_102 : i32
    %239 = tpu.assume_multiple %238, 8 : i32
    %240 = arith.index_cast %239 : i32 to index
    %c0_103 = arith.constant 0 : index
    %241 = vector.load %arg5[%240, %c0_103] : memref<64x256xf32, #tpu.memory_space<vmem>>, vector<8x256xf32>
    %c0_104 = arith.constant 0 : index
    %c0_105 = arith.constant 0 : index
    %242 = vector.load %arg2[%c0_104, %c0_105] : memref<128x256xf32, #tpu.memory_space<vmem>>, vector<128x256xf32>
    %cst_106 = arith.constant dense<0.000000e+00> : vector<8x256xf32>
    %243 = tpu.matmul %237, %242, %cst_106 {dimension_numbers = #tpu.dot_dimension_numbers<[1], [0], [0], [1], [0, 0, 1, 1], [], []>} : vector<8x128xf32>, vector<128x256xf32>, vector<8x256xf32> -> vector<8x256xf32>
    %244 = arith.addf %241, %243 : vector<8x256xf32>
    %245 = vector.extract_strided_slice %244 {offsets = [0, 0], sizes = [8, 128], strides = [1, 1]} : vector<8x256xf32> to vector<8x128xf32>
    %246 = vector.extract_strided_slice %244 {offsets = [0, 128], sizes = [8, 128], strides = [1, 1]} : vector<8x256xf32> to vector<8x128xf32>
    %cst_107 = arith.constant 5.000000e-01 : f32
    %247 = vector.broadcast %cst_107 : f32 to vector<8x128xf32>
    %248 = arith.mulf %247, %245 : vector<8x128xf32>
    %249 = math.tanh %248 : vector<8x128xf32>
    %cst_108 = arith.constant 1.000000e+00 : f32
    %250 = vector.broadcast %cst_108 : f32 to vector<8x128xf32>
    %251 = arith.addf %250, %249 : vector<8x128xf32>
    %cst_109 = arith.constant 5.000000e-01 : f32
    %252 = vector.broadcast %cst_109 : f32 to vector<8x128xf32>
    %253 = arith.mulf %252, %251 : vector<8x128xf32>
    %cst_110 = arith.constant 5.000000e-01 : f32
    %254 = vector.broadcast %cst_110 : f32 to vector<8x128xf32>
    %255 = arith.mulf %254, %246 : vector<8x128xf32>
    %256 = arith.select %6, %255, %246 : vector<8x128xi1>, vector<8x128xf32>
    %257 = math.tanh %256 : vector<8x128xf32>
    %cst_111 = arith.constant 0.000000e+00 : f32
    %258 = vector.broadcast %cst_111 : f32 to vector<8x128xf32>
    %259 = arith.select %6, %253, %258 : vector<8x128xi1>, vector<8x128xf32>
    %c64_i32_112 = arith.constant 64 : i32
    %260 = tpu.dynamic_rotate %253 by %c64_i32_112 dim 1 : vector<8x128xf32>, i32 -> vector<8x128xf32>
    %cst_113 = arith.constant 1.000000e+00 : f32
    %261 = vector.broadcast %cst_113 : f32 to vector<8x128xf32>
    %262 = arith.addf %261, %257 : vector<8x128xf32>
    %cst_114 = arith.constant 5.000000e-01 : f32
    %263 = vector.broadcast %cst_114 : f32 to vector<8x128xf32>
    %264 = arith.mulf %263, %262 : vector<8x128xf32>
    %cst_115 = arith.constant 0.000000e+00 : f32
    %265 = vector.broadcast %cst_115 : f32 to vector<8x128xf32>
    %266 = arith.select %6, %264, %265 : vector<8x128xi1>, vector<8x128xf32>
    %cst_116 = arith.constant 0.000000e+00 : f32
    %267 = vector.broadcast %cst_116 : f32 to vector<8x128xf32>
    %268 = arith.select %11, %257, %267 : vector<8x128xi1>, vector<8x128xf32>
    %c64_i32_117 = arith.constant 64 : i32
    %269 = tpu.dynamic_rotate %268 by %c64_i32_117 dim 1 : vector<8x128xf32>, i32 -> vector<8x128xf32>
    %270 = arith.mulf %266, %235 : vector<8x128xf32>
    %271 = arith.mulf %259, %269 : vector<8x128xf32>
    %272 = arith.addf %270, %271 : vector<8x128xf32>
    %273 = math.tanh %272 : vector<8x128xf32>
    %274 = arith.mulf %260, %273 : vector<8x128xf32>
    %c7_i32 = arith.constant 7 : i32
    %c8_i32_118 = arith.constant 8 : i32
    %275 = arith.muli %c7_i32, %c8_i32_118 : i32
    %276 = tpu.assume_multiple %275, 8 : i32
    %277 = arith.index_cast %276 : i32 to index
    %c0_119 = arith.constant 0 : index
    %278 = vector.load %arg5[%277, %c0_119] : memref<64x256xf32, #tpu.memory_space<vmem>>, vector<8x256xf32>
    %c0_120 = arith.constant 0 : index
    %c0_121 = arith.constant 0 : index
    %279 = vector.load %arg2[%c0_120, %c0_121] : memref<128x256xf32, #tpu.memory_space<vmem>>, vector<128x256xf32>
    %cst_122 = arith.constant dense<0.000000e+00> : vector<8x256xf32>
    %280 = tpu.matmul %274, %279, %cst_122 {dimension_numbers = #tpu.dot_dimension_numbers<[1], [0], [0], [1], [0, 0, 1, 1], [], []>} : vector<8x128xf32>, vector<128x256xf32>, vector<8x256xf32> -> vector<8x256xf32>
    %281 = arith.addf %278, %280 : vector<8x256xf32>
    %282 = vector.extract_strided_slice %281 {offsets = [0, 0], sizes = [8, 128], strides = [1, 1]} : vector<8x256xf32> to vector<8x128xf32>
    %283 = vector.extract_strided_slice %281 {offsets = [0, 128], sizes = [8, 128], strides = [1, 1]} : vector<8x256xf32> to vector<8x128xf32>
    %cst_123 = arith.constant 5.000000e-01 : f32
    %284 = vector.broadcast %cst_123 : f32 to vector<8x128xf32>
    %285 = arith.mulf %284, %282 : vector<8x128xf32>
    %286 = math.tanh %285 : vector<8x128xf32>
    %cst_124 = arith.constant 1.000000e+00 : f32
    %287 = vector.broadcast %cst_124 : f32 to vector<8x128xf32>
    %288 = arith.addf %287, %286 : vector<8x128xf32>
    %cst_125 = arith.constant 5.000000e-01 : f32
    %289 = vector.broadcast %cst_125 : f32 to vector<8x128xf32>
    %290 = arith.mulf %289, %288 : vector<8x128xf32>
    %cst_126 = arith.constant 5.000000e-01 : f32
    %291 = vector.broadcast %cst_126 : f32 to vector<8x128xf32>
    %292 = arith.mulf %291, %283 : vector<8x128xf32>
    %293 = arith.select %6, %292, %283 : vector<8x128xi1>, vector<8x128xf32>
    %294 = math.tanh %293 : vector<8x128xf32>
    %cst_127 = arith.constant 0.000000e+00 : f32
    %295 = vector.broadcast %cst_127 : f32 to vector<8x128xf32>
    %296 = arith.select %6, %290, %295 : vector<8x128xi1>, vector<8x128xf32>
    %c64_i32_128 = arith.constant 64 : i32
    %297 = tpu.dynamic_rotate %290 by %c64_i32_128 dim 1 : vector<8x128xf32>, i32 -> vector<8x128xf32>
    %cst_129 = arith.constant 1.000000e+00 : f32
    %298 = vector.broadcast %cst_129 : f32 to vector<8x128xf32>
    %299 = arith.addf %298, %294 : vector<8x128xf32>
    %cst_130 = arith.constant 5.000000e-01 : f32
    %300 = vector.broadcast %cst_130 : f32 to vector<8x128xf32>
    %301 = arith.mulf %300, %299 : vector<8x128xf32>
    %cst_131 = arith.constant 0.000000e+00 : f32
    %302 = vector.broadcast %cst_131 : f32 to vector<8x128xf32>
    %303 = arith.select %6, %301, %302 : vector<8x128xi1>, vector<8x128xf32>
    %cst_132 = arith.constant 0.000000e+00 : f32
    %304 = vector.broadcast %cst_132 : f32 to vector<8x128xf32>
    %305 = arith.select %11, %294, %304 : vector<8x128xi1>, vector<8x128xf32>
    %c64_i32_133 = arith.constant 64 : i32
    %306 = tpu.dynamic_rotate %305 by %c64_i32_133 dim 1 : vector<8x128xf32>, i32 -> vector<8x128xf32>
    %307 = arith.mulf %303, %272 : vector<8x128xf32>
    %308 = arith.mulf %296, %306 : vector<8x128xf32>
    %309 = arith.addf %307, %308 : vector<8x128xf32>
    %310 = math.tanh %309 : vector<8x128xf32>
    %311 = arith.mulf %297, %310 : vector<8x128xf32>
    %c8_i32_134 = arith.constant 8 : i32
    %cst_135 = arith.constant 1.000000e+00 : f32
    %312 = vector.broadcast %cst_135 : f32 to vector<8x128xf32>
    %313 = arith.select %13, %312, %311 : vector<8x128xi1>, vector<8x128xf32>
    %c0_136 = arith.constant 0 : index
    %c0_137 = arith.constant 0 : index
    %314 = vector.load %arg3[%c0_136, %c0_137] : memref<128x128xf32, #tpu.memory_space<vmem>>, vector<128x128xf32>
    %cst_138 = arith.constant dense<0.000000e+00> : vector<8x128xf32>
    %315 = tpu.matmul %313, %314, %cst_138 {dimension_numbers = #tpu.dot_dimension_numbers<[1], [0], [0], [1], [0, 0, 1, 1], [], []>} : vector<8x128xf32>, vector<128x128xf32>, vector<8x128xf32> -> vector<8x128xf32>
    %c0_139 = arith.constant 0 : index
    %c0_140 = arith.constant 0 : index
    %316 = vector.load %arg4[%c0_139, %c0_140] : memref<8x128xf32, #tpu.memory_space<vmem>>, vector<8x128xf32>
    tpu.vector_store %arg4[%c0_139, %c0_140], %315 {strides = array<i32>} : memref<8x128xf32, #tpu.memory_space<vmem>>, vector<8x128xf32>,
    return
  }
}

</mosaic_0001>

<bundles_post_ra>
// kernel: tpu_custom_call.1
= control target key start
LH: loop header
LB: loop body
LE: loop exit
PB: predicated region body
PF: predicated region fallthrough
CT: control target
= control target key end

     0   :  { %9 = vsyncpa [#allocation4], 0  ;;  %s1532_s0 = inlined_call_operand.vmem [shape: f32[64,4], index: 0, kind: input, shape index: {}]   ;;  %s1533_s1 = inlined_call_operand.vmem [shape: f32[4,256], index: 1, kind: input, shape index: {}]   ;;  %s1534_s2 = inlined_call_operand.hbm [shape: f32[128,256], index: 2, kind: input, shape index: {}]   ;;  %s1535_s3 = inlined_call_operand.hbm [shape: f32[128,128], index: 3, kind: input, shape index: {}]   ;;  %s1536_s4 = inlined_call_operand.hbm [shape: f32[8,128], index: 4, kind: output, shape index: {}]  }
   0x1   :  { %10 = vsyncpa [#allocation7], 0 }
   0x2   :  { %11 = vsyncpa [#allocation5], 0  ;;  %s20_s17 = sshll.u32 %s1534_s2, 4  ;;  %s991_s18 = smov [#allocation3]   ;;  %s21_s17 = int_to_ptr.hbm [resolvable:$true] %s20_s17 }
   0x3   :  { %s22_s19 = sshll.u32 %s991_s18, 4  ;;  %s33_s22 = sshll.u32 %s1535_s3, 4  ;;  %s23_s19 = int_to_ptr.vmem [resolvable:$true] %s22_s19  ;;  %s34_s22 = int_to_ptr.hbm [resolvable:$true] %s33_s22 }
   0x4   :  { %s992_s23 = smov 256   ;;  %s993_s24 = smov 16  }
   0x5   :  { %28 = dma.hbm_to_vmem [thread:$0]  %s21_s17, 4096, %s23_s19, [#allocation4], %s992_s23, %s992_s23, %s993_s24  }
   0x6   :  { %s994_s25 = smov [#allocation6]   ;;  %s995_s27 = smov 128  }
   0x7   :  { %s35_s26 = sshll.u32 %s994_s25, 4  ;;  %s996_s28 = smov 8   ;;  %s36_s26 = int_to_ptr.vmem [resolvable:$true] %s35_s26 }
   0x8   :  { %41 = dma.hbm_to_vmem [thread:$0]  %s34_s22, 2048, %s36_s26, [#allocation7], %s995_s27, %s995_s27, %s996_s28  }
   0x9   :  { %985 = dma.done.wait [#allocation4], 4096  }
   0xa   :  { %986 = vsyncadd [#allocation4], 4294963200 }
   0xb   :  { %987 = dma.done.wait [#allocation7], 2048  }
   0xc   :  { %988 = vsyncadd [#allocation7], 4294965248  ;;  %v1031_v0 = vld [vmem:[#allocation3 + $0xf8] sm:$0xff]  ;;  %v1033_v1 = vld [vmem:[#allocation3 + $0xe8] sm:$0xff]  ;;  %vm88_vm0 = vcmask 1043456   ;;  %vm63_vm1 = vcmask 31744   ;;  %v191_v39 = vlaneseq }
   0xd   :  { %255 = vmatpush.msra.mxu3 %v1031_v0  ;;  %v1036_v2 = vld [vmem:[#allocation3 + $0xf0] sm:$0xff]  ;;  %v1038_v3 = vld [vmem:[#allocation3 + $0xd8] sm:$0xff]  ;;  %v1041_v4 = vld [vmem:[#allocation3 + $0xe0] sm:$0xff]  ;;  %v997_v37 = vmov 0.0   ;;  %s998_s6 = smov 64   ;;  %s819_s22 = sshll.u32 %s1536_s4, 4  ;;  %s820_s22 = int_to_ptr.hbm [resolvable:$true] %s819_s22 }
   0xe   :  { %235 = vmatpush.msra.mxu2 %v1036_v2  ;;  %v1044_v5 = vld [vmem:[#allocation3 + $0xd0] sm:$0xff]  ;;  %v1046_v6 = vld [vmem:[#allocation3 + $0xc8] sm:$0xff]  ;;  %v1050_v7 = vld [vmem:[#allocation3 + $0xc0] sm:$0xff]  ;;  %v1275_v41 = vand.u32 127, %v191_v39 }
   0xf   :  { %256 = vmatpush.msra.mxu3 %v1033_v1  ;;  %v1052_v8 = vld [vmem:[#allocation3 + $0xb8] sm:$0xff]  ;;  %v1056_v9 = vld [vmem:[#allocation3 + $0xb0] sm:$0xff]  ;;  %v1058_v10 = vld [vmem:[#allocation3 + $0xa8] sm:$0xff] }
  0x10   :  { %236 = vmatpush.msra.mxu2 %v1041_v4  ;;  %v58_v11 = vld [vmem:[%s1533_s1] sm:$0xff]  ;;  %v1065_v12 = vld [vmem:[#allocation3 + $0xa0] sm:$0xff]  ;;  %v1071_v14 = vld [vmem:[#allocation3 + $0x90] sm:$0xff]  ;;  %vm193_vm2 = vcmp.lt.s32.totalorder %v1275_v41, 16  ;;  %vm194_vm3 = vcmp.ge.s32.totalorder %v1275_v41, 64  ;;  %vm195_vm4 = vcmp.lt.s32.totalorder %v1275_v41, 80 }
  0x11   :  { %257 = vmatpush.msra.mxu3 %v1038_v3  ;;  %60 = vst [vmem:[#allocation1] ss:$2 sm:$0xff] %v58_v11  ;;  %v1067_v13 = vld [vmem:[#allocation3 + $0x98] sm:$0xff]  ;;  %v1073_v15 = vld [vmem:[#allocation3 + $0x88] sm:$0xff]  ;;  %v1077_v16 = vld [vmem:[#allocation3 + $0x80] sm:$0xff]  ;;  %vm197_vm6 = vcmp.eq.s32.totalorder %v1275_v41, 127 }
  0x12   :  { %237 = vmatpush.msra.mxu2 %v1044_v5  ;;  %v1079_v17 = vld [vmem:[#allocation3 + $0x78] sm:$0xff]  ;;  %v1083_v18 = vld [vmem:[#allocation3 + $0x68] sm:$0xff]  ;;  %v1085_v19 = vld [vmem:[#allocation3 + $0x70] sm:$0xff] }
  0x13   :  { %258 = vmatpush.msra.mxu3 %v1046_v6  ;;  %v1090_v20 = vld [vmem:[%s1532_s0 + $0x38] sm:$0xff]  ;;  %v1094_v23 = vld [vmem:[#allocation3 + $0x60] sm:$0xff]  ;;  %v1097_v24 = vld [vmem:[#allocation3 + $0x58] sm:$0xff] }
  0x14   :  { %238 = vmatpush.msra.mxu2 %v1050_v7  ;;  %v1104_v25 = vld [vmem:[#allocation3 + $0x50] sm:$0xff]  ;;  %v1106_v26 = vld [vmem:[#allocation3 + $0x48] sm:$0xff]  ;;  %v50_v27 = vld [vmem:[%s1532_s0] sm:$0xff] }
  0x15   :  { %259 = vmatpush.msra.mxu3 %v1052_v8  ;;  %v1114_v28 = vld [vmem:[#allocation3 + $0x40] sm:$0xff]  ;;  %v1117_v29 = vld [vmem:[#allocation3 + $0x38] sm:$0xff]  ;;  %v1122_v30 = vld [vmem:[#allocation3 + $0x30] sm:$0xff] }
  0x16   :  { %239 = vmatpush.msra.mxu2 %v1056_v9  ;;  %v1125_v31 = vld [vmem:[#allocation3 + $0x28] sm:$0xff]  ;;  %v1130_v32 = vld [vmem:[#allocation3 + $0x20] sm:$0xff]  ;;  %v1133_v33 = vld [vmem:[#allocation3 + $0x18] sm:$0xff] }
  0x17   :  { %260 = vmatpush.msra.mxu3 %v1058_v10  ;;  %v1138_v34 = vld [vmem:[#allocation3 + $0x10] sm:$0xff]  ;;  %v1141_v35 = vld [vmem:[#allocation3 + $0x8] sm:$0xff]  ;;  %v1146_v36 = vld [vmem:[#allocation3] sm:$0xff] }
  0x18   :  { %240 = vmatpush.msra.mxu2 %v1065_v12  ;;  %v61_v21 = vld.sshfl [vmem:[#allocation1] sm:$0xff pattern:$0x75316420]  ;;  %v62_v22 = vld.sshfl [vmem:[#allocation1 + $0x8] sm:$0xff pattern:$0x75316420]  ;;  %vm1282_vm5 = vmand %vm194_vm3, %vm195_vm4 }
  0x19   :  { %261 = vmatpush.msra.mxu3 %v1067_v13  ;;  %855 = vmatpush.msk.msra.mxu1 %vm88_vm0, %v61_v21  ;;  %v51_v56 = vld [vmem:[%s1532_s0 + $0x8] sm:$0xff]  ;;  %v53_v39 = vld [vmem:[%s1532_s0 + $0x18] sm:$0xff]  ;;  %v782_v50 = vld [vmem:[#allocation6 + $0x38] sm:$0xff] }
  0x1a   :  { %241 = vmatpush.msra.mxu2 %v1071_v14  ;;  %845 = vmatmul.msk.f32.vlgmr.msra.gmra.mxu1 %vm63_vm1, %v1090_v20 }
  0x1b   :  { %262 = vmatpush.msra.mxu3 %v1073_v15  ;;  %846 = vmatpush.msk.msrb.mxu1 %vm88_vm0, %v62_v22 }
  0x1c   :  { %242 = vmatpush.msra.mxu2 %v1077_v16  ;;  %837 = vmatpush.msk.msra.mxu0 %vm88_vm0, %v61_v21 }
  0x1d   :  { %263 = vmatpush.msra.mxu3 %v1079_v17  ;;  %838 = vmatmul.msk.f32.vlgmr.msra.gmra.mxu0 %vm63_vm1, %v50_v27 }
  0x1e   :  { %243 = vmatpush.msra.mxu2 %v1085_v19  ;;  %391 = vmatpush.msra.mxu1 %v1031_v0 }
  0x1f   :  { %264 = vmatpush.msra.mxu3 %v1083_v18  ;;  %371 = vmatpush.msrb.mxu0 %v1036_v2 }
  0x20   :  { %244 = vmatpush.msra.mxu2 %v1094_v23  ;;  %392 = vmatpush.msra.mxu1 %v1033_v1 }
  0x21   :  { %265 = vmatpush.msra.mxu3 %v1097_v24  ;;  %372 = vmatpush.msrb.mxu0 %v1041_v4 }
  0x22   :  { %245 = vmatpush.msra.mxu2 %v1104_v25  ;;  %847 = vmatmul.msk.f32.vlgmr.msrb.gmra.mxu1 %vm63_vm1, %v50_v27 }
  0x23   :  { %266 = vmatpush.msra.mxu3 %v1106_v26  ;;  %393 = vmatpush.msra.mxu1 %v1038_v3 }
  0x24   :  { %246 = vmatpush.msra.mxu2 %v1114_v28  ;;  %373 = vmatpush.msrb.mxu0 %v1044_v5 }
  0x25   :  { %267 = vmatpush.msra.mxu3 %v1117_v29  ;;  %394 = vmatpush.msra.mxu1 %v1046_v6 }
  0x26   :  { %247 = vmatpush.msra.mxu2 %v1122_v30  ;;  %374 = vmatpush.msrb.mxu0 %v1050_v7 }
  0x27   :  { %268 = vmatpush.msra.mxu3 %v1125_v31  ;;  %395 = vmatpush.msra.mxu1 %v1052_v8 }
  0x28   :  { %248 = vmatpush.msra.mxu2 %v1130_v32  ;;  %375 = vmatpush.msrb.mxu0 %v1056_v9 }
  0x29   :  { %269 = vmatpush.msra.mxu3 %v1133_v33  ;;  %396 = vmatpush.msra.mxu1 %v1058_v10 }
  0x2a   :  { %249 = vmatpush.msra.mxu2 %v1138_v34  ;;  %376 = vmatpush.msrb.mxu0 %v1065_v12 }
  0x2b   :  { %270 = vmatpush.msra.mxu3 %v1141_v35  ;;  %397 = vmatpush.msra.mxu1 %v1067_v13 }
  0x2c   :  { %271 = vmatmul.f32.vlgmr.msra.gmra.mxu3 %v997_v37  ;;  %250 = vmatpush.msra.mxu2 %v1146_v36 }
  0x2d   :  { %251 = vmatmul.f32.vlgmr.msra.gmra.mxu2 %v997_v37  ;;  %323 = vmatpush.msrb.mxu3 %v1031_v0  ;;  %v52_v37 = vld [vmem:[%s1532_s0 + $0x10] sm:$0xff] }
  0x2e   :  { %303 = vmatpush.msrb.mxu2 %v1036_v2  ;;  %398 = vmatpush.msra.mxu1 %v1073_v15 }
  0x2f   :  { %324 = vmatpush.msrb.mxu3 %v1033_v1  ;;  %377 = vmatpush.msrb.mxu0 %v1071_v14 }
  0x30   :  { %304 = vmatpush.msrb.mxu2 %v1041_v4  ;;  %399 = vmatpush.msra.mxu1 %v1079_v17 }
  0x31   :  { %325 = vmatpush.msrb.mxu3 %v1038_v3  ;;  %378 = vmatpush.msrb.mxu0 %v1077_v16 }
  0x32   :  { %305 = vmatpush.msrb.mxu2 %v1044_v5  ;;  %400 = vmatpush.msra.mxu1 %v1083_v18 }
  0x33   :  { %326 = vmatpush.msrb.mxu3 %v1046_v6  ;;  %379 = vmatpush.msrb.mxu0 %v1085_v19 }
  0x34   :  { %306 = vmatpush.msrb.mxu2 %v1050_v7  ;;  %401 = vmatpush.msra.mxu1 %v1097_v24 }
  0x35   :  { %327 = vmatpush.msrb.mxu3 %v1052_v8  ;;  %380 = vmatpush.msrb.mxu0 %v1094_v23 }
  0x36   :  { %307 = vmatpush.msrb.mxu2 %v1056_v9  ;;  %402 = vmatpush.msra.mxu1 %v1106_v26 }
  0x37   :  { %328 = vmatpush.msrb.mxu3 %v1058_v10  ;;  %381 = vmatpush.msrb.mxu0 %v1104_v25 }
  0x38   :  { %308 = vmatpush.msrb.mxu2 %v1065_v12  ;;  %403 = vmatpush.msra.mxu1 %v1117_v29 }
  0x39   :  { %329 = vmatpush.msrb.mxu3 %v1067_v13  ;;  %382 = vmatpush.msrb.mxu0 %v1114_v28 }
  0x3a   :  { %309 = vmatpush.msrb.mxu2 %v1071_v14  ;;  %404 = vmatpush.msra.mxu1 %v1125_v31 }
  0x3b   :  { %330 = vmatpush.msrb.mxu3 %v1073_v15  ;;  %383 = vmatpush.msrb.mxu0 %v1122_v30 }
  0x3c   :  { %310 = vmatpush.msrb.mxu2 %v1077_v16  ;;  %405 = vmatpush.msra.mxu1 %v1133_v33 }
  0x3d   :  { %331 = vmatpush.msrb.mxu3 %v1079_v17  ;;  %384 = vmatpush.msrb.mxu0 %v1130_v32 }
  0x3e   :  { %311 = vmatpush.msrb.mxu2 %v1085_v19  ;;  %406 = vmatpush.msra.mxu1 %v1141_v35 }
  0x3f   :  { %332 = vmatpush.msrb.mxu3 %v1083_v18  ;;  %385 = vmatpush.msrb.mxu0 %v1138_v34 }
  0x40   :  { %312 = vmatpush.msrb.mxu2 %v1094_v23  ;;  %527 = vmatpush.msrb.mxu1 %v1031_v0 }
  0x41   :  { %333 = vmatpush.msrb.mxu3 %v1097_v24  ;;  %386 = vmatpush.msrb.mxu0 %v1146_v36 }
  0x42   :  { %313 = vmatpush.msrb.mxu2 %v1104_v25  ;;  %528 = vmatpush.msrb.mxu1 %v1033_v1 }
  0x43   :  { %334 = vmatpush.msrb.mxu3 %v1106_v26  ;;  %507 = vmatpush.msra.mxu0 %v1036_v2 }
  0x44   :  { %314 = vmatpush.msrb.mxu2 %v1114_v28  ;;  %529 = vmatpush.msrb.mxu1 %v1038_v3 }
  0x45   :  { %335 = vmatpush.msrb.mxu3 %v1117_v29  ;;  %508 = vmatpush.msra.mxu0 %v1041_v4 }
  0x46   :  { %315 = vmatpush.msrb.mxu2 %v1122_v30  ;;  %530 = vmatpush.msrb.mxu1 %v1046_v6 }
  0x47   :  { %336 = vmatpush.msrb.mxu3 %v1125_v31  ;;  %509 = vmatpush.msra.mxu0 %v1044_v5 }
  0x48   :  { %316 = vmatpush.msrb.mxu2 %v1130_v32  ;;  %531 = vmatpush.msrb.mxu1 %v1052_v8 }
  0x49   :  { %337 = vmatpush.msrb.mxu3 %v1133_v33  ;;  %510 = vmatpush.msra.mxu0 %v1050_v7 }
  0x4a   :  { %317 = vmatpush.msrb.mxu2 %v1138_v34  ;;  %532 = vmatpush.msrb.mxu1 %v1058_v10 }
  0x4b   :  { %338 = vmatpush.msrb.mxu3 %v1141_v35  ;;  %511 = vmatpush.msra.mxu0 %v1056_v9 }
  0x4c   :  { %318 = vmatpush.msrb.mxu2 %v1146_v36  ;;  %533 = vmatpush.msrb.mxu1 %v1067_v13 }
  0x4d   :  { %459 = vmatpush.msra.mxu3 %v1031_v0  ;;  %512 = vmatpush.msra.mxu0 %v1065_v12 }
  0x4e   :  { %439 = vmatpush.msra.mxu2 %v1036_v2  ;;  %534 = vmatpush.msrb.mxu1 %v1073_v15 }
  0x4f   :  { %460 = vmatpush.msra.mxu3 %v1033_v1  ;;  %513 = vmatpush.msra.mxu0 %v1071_v14 }
  0x50   :  { %440 = vmatpush.msra.mxu2 %v1041_v4  ;;  %535 = vmatpush.msrb.mxu1 %v1079_v17 }
  0x51   :  { %461 = vmatpush.msra.mxu3 %v1038_v3  ;;  %514 = vmatpush.msra.mxu0 %v1077_v16 }
  0x52   :  { %441 = vmatpush.msra.mxu2 %v1044_v5  ;;  %536 = vmatpush.msrb.mxu1 %v1083_v18 }
  0x53   :  { %462 = vmatpush.msra.mxu3 %v1046_v6  ;;  %515 = vmatpush.msra.mxu0 %v1085_v19 }
  0x54   :  { %442 = vmatpush.msra.mxu2 %v1050_v7  ;;  %537 = vmatpush.msrb.mxu1 %v1097_v24 }
  0x55   :  { %463 = vmatpush.msra.mxu3 %v1052_v8  ;;  %516 = vmatpush.msra.mxu0 %v1094_v23 }
  0x56   :  { %443 = vmatpush.msra.mxu2 %v1056_v9  ;;  %538 = vmatpush.msrb.mxu1 %v1106_v26 }
  0x57   :  { %464 = vmatpush.msra.mxu3 %v1058_v10  ;;  %517 = vmatpush.msra.mxu0 %v1104_v25 }
  0x58   :  { %444 = vmatpush.msra.mxu2 %v1065_v12  ;;  %539 = vmatpush.msrb.mxu1 %v1117_v29 }
  0x59   :  { %465 = vmatpush.msra.mxu3 %v1067_v13  ;;  %518 = vmatpush.msra.mxu0 %v1114_v28 }
  0x5a   :  { %445 = vmatpush.msra.mxu2 %v1071_v14  ;;  %540 = vmatpush.msrb.mxu1 %v1125_v31 }
  0x5b   :  { %466 = vmatpush.msra.mxu3 %v1073_v15  ;;  %519 = vmatpush.msra.mxu0 %v1122_v30 }
  0x5c   :  { %446 = vmatpush.msra.mxu2 %v1077_v16  ;;  %541 = vmatpush.msrb.mxu1 %v1133_v33 }
  0x5d   :  { %467 = vmatpush.msra.mxu3 %v1079_v17  ;;  %520 = vmatpush.msra.mxu0 %v1130_v32 }
  0x5e   :  { %447 = vmatpush.msra.mxu2 %v1085_v19  ;;  %542 = vmatpush.msrb.mxu1 %v1141_v35 }
  0x5f   :  { %468 = vmatpush.msra.mxu3 %v1083_v18  ;;  %521 = vmatpush.msra.mxu0 %v1138_v34 }
  0x60   :  { %448 = vmatpush.msra.mxu2 %v1094_v23  ;;  %839 = vmatmul.msk.f32.gmra.mxu0 %vm63_vm1, %v51_v56 }
  0x61   :  { %469 = vmatpush.msra.mxu3 %v1097_v24  ;;  %522 = vmatpush.msra.mxu0 %v1146_v36 }
  0x62   :  { %449 = vmatpush.msra.mxu2 %v1104_v25  ;;  %848 = vmatmul.msk.f32.gmra.mxu1 %vm63_vm1, %v51_v56 }
  0x63   :  { %470 = vmatpush.msra.mxu3 %v1106_v26 }
  0x64   :  { %450 = vmatpush.msra.mxu2 %v1114_v28 }
  0x65   :  { %471 = vmatpush.msra.mxu3 %v1117_v29 }
  0x66   :  { %451 = vmatpush.msra.mxu2 %v1122_v30 }
  0x67   :  { %472 = vmatpush.msra.mxu3 %v1125_v31 }
  0x68   :  { %452 = vmatpush.msra.mxu2 %v1130_v32  ;;  %840 = vmatmul.msk.f32.gmra.mxu0 %vm63_vm1, %v52_v37 }
  0x69   :  { %473 = vmatpush.msra.mxu3 %v1133_v33 }
  0x6a   :  { %453 = vmatpush.msra.mxu2 %v1138_v34  ;;  %849 = vmatmul.msk.f32.gmra.mxu1 %vm63_vm1, %v52_v37 }
  0x6b   :  { %474 = vmatpush.msra.mxu3 %v1141_v35 }
  0x6c   :  { %454 = vmatpush.msra.mxu2 %v1146_v36 }
  0x70   :  { %841 = vmatmul.msk.f32.gmra.mxu0 %vm63_vm1, %v53_v39 }
  0x72   :  { %850 = vmatmul.msk.f32.gmra.mxu1 %vm63_vm1, %v53_v39 }
  0x97   :  { %v1273_v38 = vpop.f32.mrf.mxu1 }
  0x9a   :  { %v110_v42 = vpop.f32.mrf.mxu0 }
  0x9f   :  { %v151_v40 = vpop.f32.mrf.mxu1 }
  0xaf   :  { %v272_v43 = vpop.f32.mrf.mxu3 }
  0xb0   :  { %v276_v44 = vadd.f32 %v272_v43, %v151_v40  ;;  %v252_v45 = vpop.f32.mrf.mxu2 }
  0xb1   :  { %v275_v46 = vadd.f32 %v252_v45, %v110_v42 }
  0xb2   :  { %v281_v47 = vmul.f32 0.5, %v276_v44 }
  0xb3   :  { %v277_v48 = vmul.f32 0.5, %v275_v46 }
  0xb4   :  { %v282_v49 = vsel %vm193_vm2, %v281_v47, %v276_v44 }
  0xb5   :  { %865 = vtanh.f32 %v282_v49  ;;  %v54_v49 = vld [vmem:[%s1532_s0 + $0x20] sm:$0xff] }
  0xb6   :  { %867 = vtanh.f32 %v277_v48  ;;  %851 = vmatmul.msk.f32.gmra.mxu1 %vm63_vm1, %v54_v49  ;;  %842 = vmatmul.msk.f32.gmra.mxu0 %vm63_vm1, %v54_v49 }
  0xbb   :  { %v866_v51 = vpop.eup %865 }
  0xbc   :  { %v868_v52 = vpop.eup %867  ;;  %v290_v53 = vsel %vm1282_vm5, %v866_v51, 0.0  ;;  %v287_v57 = vadd.f32 1.0, %v866_v51 }
  0xbd   :  { %v279_v54 = vadd.f32 1.0, %v868_v52  ;;  %291 = vrot.lane.b32.xlu0 %v290_v53, %s998_s6  ;;  %v55_v53 = vld [vmem:[%s1532_s0 + $0x28] sm:$0xff] }
  0xbe   :  { %v288_v58 = vmul.f32 0.5, %v287_v57  ;;  %852 = vmatmul.msk.f32.gmra.mxu1 %vm63_vm1, %v55_v53  ;;  %843 = vmatmul.msk.f32.gmra.mxu0 %vm63_vm1, %v55_v53 }
  0xbf   :  { %v280_v55 = vmul.f32 0.5, %v279_v54 }
  0xc0   :  { %v289_v59 = vsel %vm193_vm2, %v288_v58, 0.0  ;;  %v56_v58 = vld [vmem:[%s1532_s0 + $0x30] sm:$0xff]  ;;  %s999_s0 = smov [#allocation8]  }
  0xc1   :  { %v284_v61 = vsel %vm193_vm2, %v280_v55, 0.0  ;;  %v293_v62 = vmul.f32 0.0, %v289_v59  ;;  %s817_s19 = sshll.u32 %s999_s0, 4  ;;  %s818_s19 = int_to_ptr.vmem [resolvable:$true] %s817_s19 }
  0xc5   :  { %285 = vrot.lane.b32.xlu0 %v280_v55, %s998_s6 }
  0xc6   :  { %853 = vmatmul.msk.f32.gmra.mxu1 %vm63_vm1, %v56_v58  ;;  %844 = vmatmul.msk.f32.gmra.mxu0 %vm63_vm1, %v56_v58 }
  0xce   :  { %854 = vmatmul.msk.f32.gmra.mxu1 %vm63_vm1, %v1090_v20 }
  0xdd   :  { %v113_v40 = vpop.f32.mrf.mxu0 }
  0xdf   :  { %v154_v42 = vpop.f32.mrf.mxu1 }
  0xe7   :  { %v157_v20 = vpop.f32.mrf.mxu1 }
 0x12f   :  { %v292_v60 = vpop.permute.xlu0 %291 }
 0x130   :  { %v294_v63 = vmul.f32 %v292_v60, %v284_v61 }
 0x132   :  { %v1299_v11 = vadd.f32 %v294_v63, %v293_v62 }
 0x134   :  { %869 = vtanh.f32 %v1299_v11 }
 0x137   :  { %v286_v21 = vpop.permute.xlu0 %285 }
 0x13a   :  { %v870_v22 = vpop.eup %869 }
 0x13b   :  { %v297_v27 = vmul.f32 %v870_v22, %v286_v21 }
 0x13d   :  { %319 = vmatmul.f32.vlgmr.msrb.gmra.mxu2 %v297_v27  ;;  %339 = vmatmul.f32.vlgmr.msrb.gmra.mxu3 %v297_v27 }
 0x13e   :  { %575 = vmatpush.msrb.mxu2 %v1036_v2  ;;  %595 = vmatpush.msrb.mxu3 %v1031_v0 }
 0x140   :  { %576 = vmatpush.msrb.mxu2 %v1041_v4  ;;  %596 = vmatpush.msrb.mxu3 %v1033_v1 }
 0x142   :  { %577 = vmatpush.msrb.mxu2 %v1044_v5  ;;  %597 = vmatpush.msrb.mxu3 %v1038_v3 }
 0x144   :  { %578 = vmatpush.msrb.mxu2 %v1050_v7  ;;  %598 = vmatpush.msrb.mxu3 %v1046_v6 }
 0x146   :  { %579 = vmatpush.msrb.mxu2 %v1056_v9  ;;  %599 = vmatpush.msrb.mxu3 %v1052_v8 }
 0x148   :  { %580 = vmatpush.msrb.mxu2 %v1065_v12  ;;  %600 = vmatpush.msrb.mxu3 %v1058_v10 }
 0x14a   :  { %581 = vmatpush.msrb.mxu2 %v1071_v14  ;;  %601 = vmatpush.msrb.mxu3 %v1067_v13 }
 0x14c   :  { %582 = vmatpush.msrb.mxu2 %v1077_v16  ;;  %602 = vmatpush.msrb.mxu3 %v1073_v15 }
 0x14e   :  { %583 = vmatpush.msrb.mxu2 %v1085_v19  ;;  %603 = vmatpush.msrb.mxu3 %v1079_v17 }
 0x150   :  { %584 = vmatpush.msrb.mxu2 %v1094_v23  ;;  %604 = vmatpush.msrb.mxu3 %v1083_v18 }
 0x152   :  { %585 = vmatpush.msrb.mxu2 %v1104_v25  ;;  %605 = vmatpush.msrb.mxu3 %v1097_v24 }
 0x154   :  { %586 = vmatpush.msrb.mxu2 %v1114_v28  ;;  %606 = vmatpush.msrb.mxu3 %v1106_v26 }
 0x156   :  { %587 = vmatpush.msrb.mxu2 %v1122_v30  ;;  %607 = vmatpush.msrb.mxu3 %v1117_v29 }
 0x158   :  { %588 = vmatpush.msrb.mxu2 %v1130_v32  ;;  %608 = vmatpush.msrb.mxu3 %v1125_v31 }
 0x15a   :  { %589 = vmatpush.msrb.mxu2 %v1138_v34  ;;  %609 = vmatpush.msrb.mxu3 %v1133_v33 }
 0x15c   :  { %590 = vmatpush.msrb.mxu2 %v1146_v36  ;;  %610 = vmatpush.msrb.mxu3 %v1141_v35 }
 0x1c0   :  { %v320_v43 = vpop.f32.mrf.mxu2  ;;  %v340_v44 = vpop.f32.mrf.mxu3 }
 0x1c1   :  { %v343_v45 = vadd.f32 %v320_v43, %v113_v40  ;;  %v344_v46 = vadd.f32 %v340_v44, %v154_v42  ;;  %v1407_v42 = vpop.f32.mrf.mxu1 }
 0x1c3   :  { %v345_v47 = vmul.f32 0.5, %v343_v45  ;;  %v349_v48 = vmul.f32 0.5, %v344_v46 }
 0x1c5   :  { %v350_v51 = vsel %vm193_vm2, %v349_v48, %v344_v46 }
 0x1c6   :  { %871 = vtanh.f32 %v350_v51 }
 0x1c7   :  { %873 = vtanh.f32 %v345_v47 }
 0x1c9   :  { %v1411_v44 = vpop.f32.mrf.mxu1 }
 0x1cc   :  { %v872_v52 = vpop.eup %871 }
 0x1cd   :  { %v874_v54 = vpop.eup %873  ;;  %v358_v55 = vsel %vm1282_vm5, %v872_v52, 0.0  ;;  %v355_v59 = vadd.f32 1.0, %v872_v52 }
 0x1ce   :  { %359 = vrot.lane.b32.xlu1 %v358_v55, %s998_s6  ;;  %v347_v56 = vadd.f32 1.0, %v874_v54 }
 0x1cf   :  { %v356_v60 = vmul.f32 0.5, %v355_v59 }
 0x1d0   :  { %v348_v57 = vmul.f32 0.5, %v347_v56 }
 0x1d1   :  { %v357_v61 = vsel %vm193_vm2, %v356_v60, 0.0  ;;  %v1415_v46 = vpop.f32.mrf.mxu1 }
 0x1d2   :  { %v352_v63 = vsel %vm193_vm2, %v348_v57, 0.0  ;;  %v361_v21 = vmul.f32 %v357_v61, %v1299_v11  ;;  %v116_v11 = vpop.f32.mrf.mxu0 }
 0x1d6   :  { %353 = vrot.lane.b32.xlu1 %v348_v57, %s998_s6 }
 0x1d9   :  { %v1419_v48 = vpop.f32.mrf.mxu1 }
 0x1da   :  { %v1409_v43 = vpop.f32.mrf.mxu0 }
 0x1e1   :  { %v1423_v51 = vpop.f32.mrf.mxu1 }
 0x1e2   :  { %v1413_v45 = vpop.f32.mrf.mxu0 }
 0x1ea   :  { %v1417_v47 = vpop.f32.mrf.mxu0 }
 0x1f2   :  { %v1421_v49 = vpop.f32.mrf.mxu0 }
 0x240   :  { %v360_v62 = vpop.permute.xlu1 %359 }
 0x241   :  { %v362_v22 = vmul.f32 %v360_v62, %v352_v63 }
 0x243   :  { %v1372_v27 = vadd.f32 %v362_v22, %v361_v21 }
 0x245   :  { %875 = vtanh.f32 %v1372_v27 }
 0x248   :  { %v354_v39 = vpop.permute.xlu1 %353 }
 0x24b   :  { %v876_v37 = vpop.eup %875 }
 0x24c   :  { %v365_v40 = vmul.f32 %v876_v37, %v354_v39 }
 0x24e   :  { %387 = vmatmul.f32.vlgmr.msrb.gmra.mxu0 %v365_v40  ;;  %407 = vmatmul.f32.vlgmr.msra.gmra.mxu1 %v365_v40 }
 0x24f   :  { %643 = vmatpush.msrb.mxu0 %v1036_v2  ;;  %663 = vmatpush.msra.mxu1 %v1031_v0 }
 0x251   :  { %644 = vmatpush.msrb.mxu0 %v1041_v4  ;;  %664 = vmatpush.msra.mxu1 %v1033_v1 }
 0x253   :  { %645 = vmatpush.msrb.mxu0 %v1044_v5  ;;  %665 = vmatpush.msra.mxu1 %v1038_v3 }
 0x255   :  { %646 = vmatpush.msrb.mxu0 %v1050_v7  ;;  %666 = vmatpush.msra.mxu1 %v1046_v6 }
 0x257   :  { %647 = vmatpush.msrb.mxu0 %v1056_v9  ;;  %667 = vmatpush.msra.mxu1 %v1052_v8 }
 0x259   :  { %648 = vmatpush.msrb.mxu0 %v1065_v12  ;;  %668 = vmatpush.msra.mxu1 %v1058_v10 }
 0x25b   :  { %649 = vmatpush.msrb.mxu0 %v1071_v14  ;;  %669 = vmatpush.msra.mxu1 %v1067_v13 }
 0x25d   :  { %650 = vmatpush.msrb.mxu0 %v1077_v16  ;;  %670 = vmatpush.msra.mxu1 %v1073_v15 }
 0x25f   :  { %651 = vmatpush.msrb.mxu0 %v1085_v19  ;;  %671 = vmatpush.msra.mxu1 %v1079_v17 }
 0x261   :  { %652 = vmatpush.msrb.mxu0 %v1094_v23  ;;  %672 = vmatpush.msra.mxu1 %v1083_v18 }
 0x263   :  { %653 = vmatpush.msrb.mxu0 %v1104_v25  ;;  %673 = vmatpush.msra.mxu1 %v1097_v24 }
 0x265   :  { %654 = vmatpush.msrb.mxu0 %v1114_v28  ;;  %674 = vmatpush.msra.mxu1 %v1106_v26 }
 0x267   :  { %655 = vmatpush.msrb.mxu0 %v1122_v30  ;;  %675 = vmatpush.msra.mxu1 %v1117_v29 }
 0x269   :  { %656 = vmatpush.msrb.mxu0 %v1130_v32  ;;  %676 = vmatpush.msra.mxu1 %v1125_v31 }
 0x26b   :  { %657 = vmatpush.msrb.mxu0 %v1138_v34  ;;  %677 = vmatpush.msra.mxu1 %v1133_v33 }
 0x26d   :  { %658 = vmatpush.msrb.mxu0 %v1146_v36  ;;  %678 = vmatpush.msra.mxu1 %v1141_v35 }
 0x2cb   :  { %v388_v52 = vpop.f32.mrf.mxu0  ;;  %v408_v53 = vpop.f32.mrf.mxu1 }
 0x2cc   :  { %v411_v54 = vadd.f32 %v388_v52, %v116_v11  ;;  %v412_v55 = vadd.f32 %v408_v53, %v157_v20 }
 0x2ce   :  { %v413_v56 = vmul.f32 0.5, %v411_v54  ;;  %v417_v57 = vmul.f32 0.5, %v412_v55 }
 0x2d0   :  { %v418_v58 = vsel %vm193_vm2, %v417_v57, %v412_v55 }
 0x2d1   :  { %877 = vtanh.f32 %v418_v58 }
 0x2d2   :  { %879 = vtanh.f32 %v413_v56 }
 0x2d7   :  { %v878_v59 = vpop.eup %877 }
 0x2d8   :  { %v880_v60 = vpop.eup %879  ;;  %v426_v61 = vsel %vm1282_vm5, %v878_v59, 0.0  ;;  %v423_v21 = vadd.f32 1.0, %v878_v59 }
 0x2d9   :  { %427 = vrot.lane.b32.xlu2 %v426_v61, %s998_s6  ;;  %v415_v62 = vadd.f32 1.0, %v880_v60 }
 0x2da   :  { %v424_v22 = vmul.f32 0.5, %v423_v21 }
 0x2db   :  { %v416_v63 = vmul.f32 0.5, %v415_v62 }
 0x2dc   :  { %v425_v37 = vsel %vm193_vm2, %v424_v22, 0.0 }
 0x2dd   :  { %v420_v40 = vsel %vm193_vm2, %v416_v63, 0.0  ;;  %v429_v20 = vmul.f32 %v425_v37, %v1372_v27 }
 0x2e1   :  { %421 = vrot.lane.b32.xlu2 %v416_v63, %s998_s6 }
 0x333   :  { %v428_v39 = vpop.permute.xlu2 %427 }
 0x334   :  { %v430_v11 = vmul.f32 %v428_v39, %v420_v40 }
 0x336   :  { %v431_v52 = vadd.f32 %v430_v11, %v429_v20 }
 0x338   :  { %881 = vtanh.f32 %v431_v52 }
 0x33b   :  { %v422_v54 = vpop.permute.xlu2 %421 }
 0x33e   :  { %v882_v53 = vpop.eup %881 }
 0x33f   :  { %v433_v55 = vmul.f32 %v882_v53, %v422_v54 }
 0x341   :  { %455 = vmatmul.f32.vlgmr.msra.gmra.mxu2 %v433_v55  ;;  %475 = vmatmul.f32.vlgmr.msra.gmra.mxu3 %v433_v55 }
 0x342   :  { %711 = vmatpush.msra.mxu2 %v1036_v2  ;;  %731 = vmatpush.msra.mxu3 %v1031_v0 }
 0x344   :  { %712 = vmatpush.msra.mxu2 %v1041_v4  ;;  %732 = vmatpush.msra.mxu3 %v1033_v1 }
 0x346   :  { %713 = vmatpush.msra.mxu2 %v1044_v5  ;;  %733 = vmatpush.msra.mxu3 %v1038_v3 }
 0x348   :  { %714 = vmatpush.msra.mxu2 %v1050_v7  ;;  %734 = vmatpush.msra.mxu3 %v1046_v6 }
 0x34a   :  { %715 = vmatpush.msra.mxu2 %v1056_v9  ;;  %735 = vmatpush.msra.mxu3 %v1052_v8 }
 0x34c   :  { %716 = vmatpush.msra.mxu2 %v1065_v12  ;;  %736 = vmatpush.msra.mxu3 %v1058_v10 }
 0x34e   :  { %717 = vmatpush.msra.mxu2 %v1071_v14  ;;  %737 = vmatpush.msra.mxu3 %v1067_v13 }
 0x350   :  { %718 = vmatpush.msra.mxu2 %v1077_v16  ;;  %738 = vmatpush.msra.mxu3 %v1073_v15 }
 0x352   :  { %719 = vmatpush.msra.mxu2 %v1085_v19  ;;  %739 = vmatpush.msra.mxu3 %v1079_v17 }
 0x354   :  { %720 = vmatpush.msra.mxu2 %v1094_v23  ;;  %740 = vmatpush.msra.mxu3 %v1083_v18 }
 0x356   :  { %721 = vmatpush.msra.mxu2 %v1104_v25  ;;  %741 = vmatpush.msra.mxu3 %v1097_v24 }
 0x358   :  { %722 = vmatpush.msra.mxu2 %v1114_v28  ;;  %742 = vmatpush.msra.mxu3 %v1106_v26 }
 0x35a   :  { %723 = vmatpush.msra.mxu2 %v1122_v30  ;;  %743 = vmatpush.msra.mxu3 %v1117_v29 }
 0x35c   :  { %724 = vmatpush.msra.mxu2 %v1130_v32  ;;  %744 = vmatpush.msra.mxu3 %v1125_v31 }
 0x35e   :  { %725 = vmatpush.msra.mxu2 %v1138_v34  ;;  %745 = vmatpush.msra.mxu3 %v1133_v33 }
 0x360   :  { %726 = vmatpush.msra.mxu2 %v1146_v36  ;;  %746 = vmatpush.msra.mxu3 %v1141_v35 }
 0x3c4   :  { %v456_v0 = vpop.f32.mrf.mxu2  ;;  %v476_v1 = vpop.f32.mrf.mxu3 }
 0x3c5   :  { %v479_v2 = vadd.f32 %v456_v0, %v1409_v43  ;;  %v480_v3 = vadd.f32 %v476_v1, %v1407_v42 }
 0x3c7   :  { %v481_v4 = vmul.f32 0.5, %v479_v2  ;;  %v485_v5 = vmul.f32 0.5, %v480_v3 }
 0x3c9   :  { %883 = vtanh.f32 %v481_v4  ;;  %v486_v6 = vsel %vm193_vm2, %v485_v5, %v480_v3 }
 0x3ca   :  { %885 = vtanh.f32 %v486_v6 }
 0x3cf   :  { %v884_v7 = vpop.eup %883 }
 0x3d0   :  { %v886_v8 = vpop.eup %885  ;;  %v483_v9 = vadd.f32 1.0, %v884_v7 }
 0x3d1   :  { %v494_v10 = vsel %vm1282_vm5, %v886_v8, 0.0  ;;  %v491_v13 = vadd.f32 1.0, %v886_v8 }
 0x3d2   :  { %v484_v12 = vmul.f32 0.5, %v483_v9  ;;  %495 = vrot.lane.b32.xlu0 %v494_v10, %s998_s6 }
 0x3d3   :  { %v492_v14 = vmul.f32 0.5, %v491_v13 }
 0x3d4   :  { %489 = vrot.lane.b32.xlu1 %v484_v12, %s998_s6  ;;  %v488_v17 = vsel %vm193_vm2, %v484_v12, 0.0 }
 0x3d5   :  { %v493_v15 = vsel %vm193_vm2, %v492_v14, 0.0 }
 0x3d6   :  { %v497_v18 = vmul.f32 %v493_v15, %v431_v52 }
 0x444   :  { %v496_v16 = vpop.permute.xlu0 %495 }
 0x445   :  { %v498_v19 = vmul.f32 %v496_v16, %v488_v17 }
 0x446   :  { %v490_v25 = vpop.permute.xlu1 %489 }
 0x447   :  { %v499_v23 = vadd.f32 %v498_v19, %v497_v18 }
 0x449   :  { %887 = vtanh.f32 %v499_v23 }
 0x44f   :  { %v888_v24 = vpop.eup %887 }
 0x450   :  { %v501_v26 = vmul.f32 %v888_v24, %v490_v25 }
 0x452   :  { %523 = vmatmul.f32.vlgmr.msra.gmra.mxu0 %v501_v26  ;;  %543 = vmatmul.f32.vlgmr.msrb.gmra.mxu1 %v501_v26 }
 0x4cf   :  { %v524_v28 = vpop.f32.mrf.mxu0  ;;  %v544_v29 = vpop.f32.mrf.mxu1 }
 0x4d0   :  { %v547_v30 = vadd.f32 %v524_v28, %v1413_v45  ;;  %v548_v31 = vadd.f32 %v544_v29, %v1411_v44 }
 0x4d2   :  { %v549_v32 = vmul.f32 0.5, %v547_v30  ;;  %v553_v33 = vmul.f32 0.5, %v548_v31 }
 0x4d4   :  { %889 = vtanh.f32 %v549_v32  ;;  %v554_v34 = vsel %vm193_vm2, %v553_v33, %v548_v31 }
 0x4d5   :  { %891 = vtanh.f32 %v554_v34 }
 0x4da   :  { %v890_v35 = vpop.eup %889 }
 0x4db   :  { %v892_v36 = vpop.eup %891  ;;  %v551_v27 = vadd.f32 1.0, %v890_v35 }
 0x4dc   :  { %v562_v42 = vsel %vm1282_vm5, %v892_v36, 0.0  ;;  %v559_v45 = vadd.f32 1.0, %v892_v36 }
 0x4dd   :  { %v552_v43 = vmul.f32 0.5, %v551_v27  ;;  %563 = vrot.lane.b32.xlu2 %v562_v42, %s998_s6  ;;  %v790_v27 = vld [vmem:[#allocation6 + $0x78] sm:$0xff] }
 0x4de   :  { %v560_v44 = vmul.f32 0.5, %v559_v45  ;;  %791 = vmatpush.msra.mxu0 %v790_v27 }
 0x4df   :  { %557 = vrot.lane.b32.xlu0 %v552_v43, %s998_s6  ;;  %v556_v58 = vsel %vm193_vm2, %v552_v43, 0.0 }
 0x4e0   :  { %v561_v56 = vsel %vm193_vm2, %v560_v44, 0.0 }
 0x4e1   :  { %v565_v59 = vmul.f32 %v561_v56, %v499_v23 }
 0x537   :  { %v564_v57 = vpop.permute.xlu2 %563 }
 0x538   :  { %v566_v60 = vmul.f32 %v564_v57, %v556_v58 }
 0x53a   :  { %v567_v61 = vadd.f32 %v566_v60, %v565_v59 }
 0x53c   :  { %893 = vtanh.f32 %v567_v61 }
 0x542   :  { %v894_v62 = vpop.eup %893 }
 0x551   :  { %v558_v63 = vpop.permute.xlu0 %557 }
 0x552   :  { %v569_v21 = vmul.f32 %v894_v62, %v558_v63 }
 0x554   :  { %591 = vmatmul.f32.vlgmr.msrb.gmra.mxu2 %v569_v21  ;;  %611 = vmatmul.f32.vlgmr.msrb.gmra.mxu3 %v569_v21  ;;  %v787_v21 = vld [vmem:[#allocation6 + $0x60] sm:$0xff] }
 0x5d7   :  { %v592_v22 = vpop.f32.mrf.mxu2  ;;  %v612_v37 = vpop.f32.mrf.mxu3 }
 0x5d8   :  { %v615_v39 = vadd.f32 %v592_v22, %v1417_v47  ;;  %v616_v40 = vadd.f32 %v612_v37, %v1415_v46  ;;  %v786_v22 = vld [vmem:[#allocation6 + $0x58] sm:$0xff]  ;;  %v785_v37 = vld [vmem:[#allocation6 + $0x50] sm:$0xff] }
 0x5da   :  { %v617_v20 = vmul.f32 0.5, %v615_v39  ;;  %v621_v11 = vmul.f32 0.5, %v616_v40  ;;  %v784_v39 = vld [vmem:[#allocation6 + $0x48] sm:$0xff] }
 0x5dc   :  { %895 = vtanh.f32 %v617_v20  ;;  %v622_v52 = vsel %vm193_vm2, %v621_v11, %v616_v40  ;;  %v783_v40 = vld [vmem:[#allocation6 + $0x40] sm:$0xff]  ;;  %v781_v20 = vld [vmem:[#allocation6 + $0x30] sm:$0xff]  ;;  %v780_v11 = vld [vmem:[#allocation6 + $0x28] sm:$0xff] }
 0x5dd   :  { %897 = vtanh.f32 %v622_v52  ;;  %v779_v52 = vld [vmem:[#allocation6 + $0x20] sm:$0xff] }
 0x5e2   :  { %v896_v53 = vpop.eup %895 }
 0x5e3   :  { %v898_v54 = vpop.eup %897  ;;  %v619_v55 = vadd.f32 1.0, %v896_v53  ;;  %v778_v53 = vld [vmem:[#allocation6 + $0x18] sm:$0xff] }
 0x5e4   :  { %v630_v0 = vsel %vm1282_vm5, %v898_v54, 0.0  ;;  %v627_v47 = vadd.f32 1.0, %v898_v54 }
 0x5e5   :  { %v620_v1 = vmul.f32 0.5, %v619_v55  ;;  %631 = vrot.lane.b32.xlu1 %v630_v0, %s998_s6  ;;  %v777_v55 = vld [vmem:[#allocation6 + $0x10] sm:$0xff] }
 0x5e6   :  { %v628_v46 = vmul.f32 0.5, %v627_v47  ;;  %v775_v47 = vld [vmem:[#allocation6] sm:$0xff] }
 0x5e7   :  { %625 = vrot.lane.b32.xlu2 %v620_v1, %s998_s6  ;;  %v624_v4 = vsel %vm193_vm2, %v620_v1, 0.0  ;;  %v776_v1 = vld [vmem:[#allocation6 + $0x8] sm:$0xff] }
 0x5e8   :  { %v629_v2 = vsel %vm193_vm2, %v628_v46, 0.0 }
 0x5e9   :  { %v633_v5 = vmul.f32 %v629_v2, %v567_v61 }
 0x641   :  { %v626_v9 = vpop.permute.xlu2 %625 }
 0x657   :  { %v632_v3 = vpop.permute.xlu1 %631 }
 0x658   :  { %v634_v6 = vmul.f32 %v632_v3, %v624_v4 }
 0x65a   :  { %v635_v7 = vadd.f32 %v634_v6, %v633_v5 }
 0x65c   :  { %899 = vtanh.f32 %v635_v7 }
 0x662   :  { %v900_v8 = vpop.eup %899 }
 0x663   :  { %v637_v10 = vmul.f32 %v900_v8, %v626_v9 }
 0x665   :  { %659 = vmatmul.f32.vlgmr.msrb.gmra.mxu0 %v637_v10  ;;  %679 = vmatmul.f32.vlgmr.msra.gmra.mxu1 %v637_v10 }
 0x6e2   :  { %v660_v12 = vpop.f32.mrf.mxu0  ;;  %v680_v13 = vpop.f32.mrf.mxu1 }
 0x6e3   :  { %v683_v14 = vadd.f32 %v660_v12, %v1421_v49  ;;  %v684_v15 = vadd.f32 %v680_v13, %v1419_v48 }
 0x6e5   :  { %v685_v16 = vmul.f32 0.5, %v683_v14  ;;  %v689_v17 = vmul.f32 0.5, %v684_v15 }
 0x6e7   :  { %901 = vtanh.f32 %v685_v16  ;;  %v690_v18 = vsel %vm193_vm2, %v689_v17, %v684_v15 }
 0x6e8   :  { %903 = vtanh.f32 %v690_v18 }
 0x6ed   :  { %v902_v19 = vpop.eup %901 }
 0x6ee   :  { %v904_v23 = vpop.eup %903  ;;  %v687_v24 = vadd.f32 1.0, %v902_v19 }
 0x6ef   :  { %v698_v25 = vsel %vm1282_vm5, %v904_v23, 0.0  ;;  %v695_v49 = vadd.f32 1.0, %v904_v23 }
 0x6f0   :  { %v688_v26 = vmul.f32 0.5, %v687_v24  ;;  %699 = vrot.lane.b32.xlu0 %v698_v25, %s998_s6 }
 0x6f1   :  { %v696_v48 = vmul.f32 0.5, %v695_v49 }
 0x6f2   :  { %693 = vrot.lane.b32.xlu1 %v688_v26, %s998_s6  ;;  %v692_v30 = vsel %vm193_vm2, %v688_v26, 0.0 }
 0x6f3   :  { %v697_v28 = vsel %vm193_vm2, %v696_v48, 0.0 }
 0x6f4   :  { %v701_v31 = vmul.f32 %v697_v28, %v635_v7 }
 0x762   :  { %v700_v29 = vpop.permute.xlu0 %699 }
 0x763   :  { %v702_v32 = vmul.f32 %v700_v29, %v692_v30 }
 0x764   :  { %v694_v35 = vpop.permute.xlu1 %693 }
 0x765   :  { %v703_v33 = vadd.f32 %v702_v32, %v701_v31 }
 0x767   :  { %905 = vtanh.f32 %v703_v33 }
 0x76d   :  { %v906_v34 = vpop.eup %905 }
 0x76e   :  { %v705_v36 = vmul.f32 %v906_v34, %v694_v35 }
 0x770   :  { %727 = vmatmul.f32.vlgmr.msra.gmra.mxu2 %v705_v36  ;;  %747 = vmatmul.f32.vlgmr.msra.gmra.mxu3 %v705_v36 }
 0x7f3   :  { %v728_v42 = vpop.f32.mrf.mxu2  ;;  %v748_v43 = vpop.f32.mrf.mxu3 }
 0x7f4   :  { %v751_v45 = vadd.f32 %v728_v42, %v1273_v38  ;;  %v752_v44 = vadd.f32 %v748_v43, %v1423_v51  ;;  %v789_v38 = vld [vmem:[#allocation6 + $0x70] sm:$0xff]  ;;  %v788_v51 = vld [vmem:[#allocation6 + $0x68] sm:$0xff] }
 0x7f5   :  { %792 = vmatpush.msra.mxu0 %v789_v38 }
 0x7f6   :  { %v753_v56 = vmul.f32 0.5, %v751_v45  ;;  %v757_v57 = vmul.f32 0.5, %v752_v44 }
 0x7f7   :  { %793 = vmatpush.msra.mxu0 %v788_v51 }
 0x7f8   :  { %907 = vtanh.f32 %v753_v56  ;;  %v758_v58 = vsel %vm193_vm2, %v757_v57, %v752_v44 }
 0x7f9   :  { %909 = vtanh.f32 %v758_v58  ;;  %794 = vmatpush.msra.mxu0 %v787_v21 }
 0x7fb   :  { %795 = vmatpush.msra.mxu0 %v786_v22 }
 0x7fd   :  { %796 = vmatpush.msra.mxu0 %v785_v37 }
 0x7fe   :  { %v908_v59 = vpop.eup %907 }
 0x7ff   :  { %v910_v60 = vpop.eup %909  ;;  %v755_v61 = vadd.f32 1.0, %v908_v59  ;;  %797 = vmatpush.msra.mxu0 %v784_v39 }
 0x800   :  { %v766_v62 = vsel %vm1282_vm5, %v910_v60, 0.0  ;;  %v763_v54 = vadd.f32 1.0, %v910_v60 }
 0x801   :  { %v756_v63 = vmul.f32 0.5, %v755_v61  ;;  %767 = vrot.lane.b32.xlu2 %v766_v62, %s998_s6  ;;  %798 = vmatpush.msra.mxu0 %v783_v40 }
 0x802   :  { %v764_v0 = vmul.f32 0.5, %v763_v54 }
 0x803   :  { %761 = vrot.lane.b32.xlu0 %v756_v63, %s998_s6  ;;  %799 = vmatpush.msra.mxu0 %v782_v50  ;;  %v760_v3 = vsel %vm193_vm2, %v756_v63, 0.0 }
 0x804   :  { %v765_v46 = vsel %vm193_vm2, %v764_v0, 0.0 }
 0x805   :  { %800 = vmatpush.msra.mxu0 %v781_v20  ;;  %v769_v4 = vmul.f32 %v765_v46, %v703_v33 }
 0x807   :  { %801 = vmatpush.msra.mxu0 %v780_v11 }
 0x809   :  { %802 = vmatpush.msra.mxu0 %v779_v52 }
 0x80b   :  { %803 = vmatpush.msra.mxu0 %v778_v53 }
 0x80d   :  { %804 = vmatpush.msra.mxu0 %v777_v55 }
 0x80f   :  { %805 = vmatpush.msra.mxu0 %v776_v1 }
 0x811   :  { %806 = vmatpush.msra.mxu0 %v775_v47 }
 0x85b   :  { %v768_v2 = vpop.permute.xlu2 %767 }
 0x85c   :  { %v770_v5 = vmul.f32 %v768_v2, %v760_v3 }
 0x85e   :  { %v771_v6 = vadd.f32 %v770_v5, %v769_v4 }
 0x860   :  { %911 = vtanh.f32 %v771_v6 }
 0x866   :  { %v912_v7 = vpop.eup %911 }
 0x875   :  { %v762_v8 = vpop.permute.xlu0 %761 }
 0x876   :  { %v773_v9 = vmul.f32 %v912_v7, %v762_v8 }
 0x878   :  { %v774_v10 = vsel %vm197_vm6, 1.0, %v773_v9 }
 0x879   :  { %807 = vmatmul.f32.vlgmr.msra.gmra.mxu0 %v774_v10 }
 0x8f6   :  { %v808_v12 = vpop.f32.mrf.mxu0 }
 0x8f7   :  { %811 = vst [vmem:[#allocation8] sm:$0xff] %v808_v12 }
 0x8f8   :  { %822 = dma.vmem_to_hbm [thread:$0]  %s818_s19, 128, %s820_s22, [#allocation5]  }
 0x8f9   :  { %989 = dma.done.wait [#allocation5], 128  }
 0x8fa   :  { %990 = vsyncadd [#allocation5], 4294967168 }
 0x8fb   :  { %827 = vsyncpa [#allocation4], 1 }
 0x8fc   :  { %828 = vsyncpa [#allocation7], 1 }
 0x8fd   :  { %829 = vsyncpa [#allocation5], 1 }

</bundles_post_ra>
